<compile_context>
chip_gen: v7x
topology: tpu7x:2x2x1
jax: 0.10.0
libtpu: 0.0.40
codegen_flags: <defaults>
</compile_context>

<pallas_src>
import functools

import jax
import jax.numpy as jnp
from jax.experimental import pallas as pl
from jax.experimental.pallas import tpu as pltpu


# ----------------------------------------------------------------------------
# Kernels
# ----------------------------------------------------------------------------

def fused_gin_kernel(a_ref, x_ref,
                     w11, b11, w12, b12,
                     w21, b21, w22, b22,
                     w31, b31, w32, b32,
                     pool_ref, wl1, bl1, wl2, bl2,
                     out_ref):
    """Whole GIN forward (3 convs + add-pool + head) with A_hat resident in VMEM."""
    f32 = jnp.float32
    bf16 = jnp.bfloat16

    a = a_ref[...].astype(bf16)          # int8 -> bf16 widen, hidden under DMA

    def conv(h_bf16, w1, b1, w2, b2):
        # agg = A_hat @ h  (A_hat already includes the (1+eps)*I self term, eps=0)
        agg = jnp.dot(a, h_bf16, preferred_element_type=f32)
        z = jnp.dot(agg.astype(bf16), w1[...], preferred_element_type=f32) + b1[...]
        z = jnp.maximum(z, 0.0)
        z = jnp.dot(z.astype(bf16), w2[...], preferred_element_type=f32) + b2[...]
        return jnp.maximum(z, 0.0).astype(bf16)

    h = x_ref[...]                                       # bf16 (n_pad, f_pad)
    h = conv(h, w11, b11, w12, b12)                      # conv1 (+ idempotent relu)
    h = conv(h, w21, b21, w22, b22)                      # conv2 (+ idempotent relu)
    h = conv(h, w31, b31, w32, b32)                      # conv3

    # global_add_pool + lin1 -> ReLU -> dropout(identity) -> lin2
    p = jnp.dot(pool_ref[...].astype(bf16), h, preferred_element_type=f32)
    p = jnp.dot(p.astype(bf16), wl1[...], preferred_element_type=f32) + bl1[...]
    p = jnp.maximum(p, 0.0)
    out_ref[...] = jnp.dot(p.astype(bf16), wl2[...], preferred_element_type=f32) + bl2[...]


def gin_conv_kernel(a_ref, h_ref, w1_ref, b1_ref, w2_ref, b2_ref, out_ref, acc_ref, *, tk):
    """One GINConv layer, tiled: agg = A_hat @ H (reduction over k), then fused MLP."""
    k = pl.program_id(1)

    @pl.when(k == 0)
    def _():
        acc_ref[...] = jnp.zeros_like(acc_ref)

    a = a_ref[...].astype(jnp.bfloat16)                      # int8 tile -> bf16
    start = pl.multiple_of(k * tk, tk)
    h_blk = h_ref[pl.ds(start, tk), :]                       # resident H, bf16
    acc_ref[...] += jnp.dot(a, h_blk, preferred_element_type=jnp.float32)

    @pl.when(k == pl.num_programs(1) - 1)
    def _():
        agg = acc_ref[...]
        z = jnp.dot(agg.astype(jnp.bfloat16), w1_ref[...],
                    preferred_element_type=jnp.float32) + b1_ref[...]
        z = jnp.maximum(z, 0.0)
        z = jnp.dot(z.astype(jnp.bfloat16), w2_ref[...],
                    preferred_element_type=jnp.float32) + b2_ref[...]
        out_ref[...] = jnp.maximum(z, 0.0).astype(out_ref.dtype)


def pool_head_kernel(pool_ref, h_ref, wl1_ref, bl1_ref, wl2_ref, bl2_ref, out_ref, acc_ref):
    """global_add_pool (tiled over nodes) + lin1 -> ReLU -> (dropout=id) -> lin2."""
    k = pl.program_id(0)

    @pl.when(k == 0)
    def _():
        acc_ref[...] = jnp.zeros_like(acc_ref)

    acc_ref[...] += jnp.dot(pool_ref[...].astype(jnp.bfloat16), h_ref[...],
                            preferred_element_type=jnp.float32)

    @pl.when(k == pl.num_programs(0) - 1)
    def _():
        p = jnp.dot(acc_ref[...].astype(jnp.bfloat16), wl1_ref[...],
                    preferred_element_type=jnp.float32) + bl1_ref[...]
        p = jnp.maximum(p, 0.0)
        out_ref[...] = jnp.dot(p.astype(jnp.bfloat16), wl2_ref[...],
                               preferred_element_type=jnp.float32) + bl2_ref[...]


# ----------------------------------------------------------------------------
# pallas_call wrappers
# ----------------------------------------------------------------------------

def _round_up(v, m):
    return (v + m - 1) // m * m


def _vmem_limit():
    # <= 3/4 of physical VMEM (v7x: 48 MiB of 64; v5e/v6e: capped at 96 of 128 MiB).
    try:
        cap = pltpu.get_tpu_info().vmem_capacity_bytes
        return int(min(cap * 3 // 4, 96 * 1024 * 1024))
    except Exception:
        return 48 * 1024 * 1024


def _fused_fits(n_pad, f_pad, dh_pad, g_pad):
    """Rough in-kernel VMEM estimate for the fused path (keep well under v7x budget)."""
    w = max(f_pad, dh_pad)
    est = (n_pad * n_pad * 3              # A_hat: int8 copy + bf16 widened copy
           + n_pad * f_pad * 2            # x (bf16)
           + 2 * n_pad * w * 4            # two live f32 activation temporaries
           + g_pad * n_pad * 1            # pool (int8)
           + (f_pad * dh_pad + 6 * dh_pad * dh_pad + dh_pad * 128) * 2)  # bf16 weights
    return est <= 20 * 1024 * 1024


def fused_gin(a_hat, x_p, conv_params, pool, head_params, g_pad, out_pad):
    (w11, b11, w12, b12), (w21, b21, w22, b22), (w31, b31, w32, b32) = conv_params
    wl1, bl1, wl2, bl2 = head_params
    return pl.pallas_call(
        fused_gin_kernel,
        out_shape=jax.ShapeDtypeStruct((g_pad, out_pad), jnp.float32),
        compiler_params=pltpu.CompilerParams(vmem_limit_bytes=_vmem_limit()),
    )(a_hat, x_p,
      w11, b11, w12, b12,
      w21, b21, w22, b22,
      w31, b31, w32, b32,
      pool, wl1, bl1, wl2, bl2)


def gin_conv_layer(a_hat, h, w1, b1, w2, b2, *, tm, tk):
    n_pad = a_hat.shape[0]
    f_in = h.shape[1]
    d_out = w2.shape[1]
    grid = (n_pad // tm, n_pad // tk)
    return pl.pallas_call(
        functools.partial(gin_conv_kernel, tk=tk),
        out_shape=jax.ShapeDtypeStruct((n_pad, d_out), jnp.bfloat16),
        grid_spec=pltpu.PrefetchScalarGridSpec(
            num_scalar_prefetch=0,
            grid=grid,
            in_specs=[
                pl.BlockSpec((tm, tk), lambda i, k: (i, k)),        # A_hat tile (int8)
                pl.BlockSpec((n_pad, f_in), lambda i, k: (0, 0)),   # H resident (bf16)
                pl.BlockSpec((f_in, d_out), lambda i, k: (0, 0)),   # W1 (BN folded, bf16)
                pl.BlockSpec((1, d_out), lambda i, k: (0, 0)),      # b1 (f32)
                pl.BlockSpec((d_out, d_out), lambda i, k: (0, 0)),  # W2 (bf16)
                pl.BlockSpec((1, d_out), lambda i, k: (0, 0)),      # b2 (f32)
            ],
            out_specs=pl.BlockSpec((tm, d_out), lambda i, k: (i, 0)),
            scratch_shapes=[pltpu.VMEM((tm, f_in), jnp.float32)],
        ),
        compiler_params=pltpu.CompilerParams(
            dimension_semantics=("parallel", "arbitrary"),
            vmem_limit_bytes=_vmem_limit(),
        ),
    )(a_hat, h, w1, b1, w2, b2)


def pool_head(pool_mat, h, wl1, bl1, wl2, bl2, *, tk):
    n_pad = h.shape[0]
    g_pad = pool_mat.shape[0]
    d_h = h.shape[1]
    out_w = wl2.shape[1]
    grid = (n_pad // tk,)
    return pl.pallas_call(
        pool_head_kernel,
        out_shape=jax.ShapeDtypeStruct((g_pad, out_w), jnp.float32),
        grid_spec=pltpu.PrefetchScalarGridSpec(
            num_scalar_prefetch=0,
            grid=grid,
            in_specs=[
                pl.BlockSpec((g_pad, tk), lambda k: (0, k)),     # pooling tile (int8)
                pl.BlockSpec((tk, d_h), lambda k: (k, 0)),       # H tile (bf16)
                pl.BlockSpec((d_h, d_h), lambda k: (0, 0)),      # lin1 W (bf16)
                pl.BlockSpec((1, d_h), lambda k: (0, 0)),        # lin1 b (f32)
                pl.BlockSpec((d_h, out_w), lambda k: (0, 0)),    # lin2 W (lane-padded)
                pl.BlockSpec((1, out_w), lambda k: (0, 0)),      # lin2 b (lane-padded)
            ],
            out_specs=pl.BlockSpec((g_pad, out_w), lambda k: (0, 0)),
            scratch_shapes=[pltpu.VMEM((g_pad, d_h), jnp.float32)],
        ),
        compiler_params=pltpu.CompilerParams(
            dimension_semantics=("arbitrary",),
            vmem_limit_bytes=_vmem_limit(),
        ),
    )(pool_mat, h, wl1, bl1, wl2, bl2)


# ----------------------------------------------------------------------------
# Parameter init (PyTorch-style defaults, eval mode) with BN folded into Linear1
# ----------------------------------------------------------------------------

def _linear_init(key, fan_in, fan_out):
    kw, kb = jax.random.split(key)
    bound = 1.0 / jnp.sqrt(jnp.float32(fan_in))
    # stored transposed: [in, out] so kernels compute x @ W + b
    w = jax.random.uniform(kw, (fan_in, fan_out), jnp.float32, -bound, bound)
    b = jax.random.uniform(kb, (1, fan_out), jnp.float32, -bound, bound)
    return w, b


def init_gin_params(key, dim_h, in_dim=11):
    ks = jax.random.split(key, 8)
    params = {}
    in_dims = [in_dim, dim_h, dim_h]
    for li in range(3):
        w1, b1 = _linear_init(ks[2 * li], in_dims[li], dim_h)
        w2, b2 = _linear_init(ks[2 * li + 1], dim_h, dim_h)
        # BatchNorm1d defaults: gamma=1, beta=0, running_mean=0, running_var=1, eps=1e-5
        gamma = jnp.ones((1, dim_h), jnp.float32)
        beta = jnp.zeros((1, dim_h), jnp.float32)
        rmean = jnp.zeros((1, dim_h), jnp.float32)
        rvar = jnp.ones((1, dim_h), jnp.float32)
        eps = 1e-5
        scale = gamma / jnp.sqrt(rvar + eps)
        shift = beta - rmean * scale
        # Fold BN (eval) into the first Linear:  (x@w1 + b1)*scale + shift
        params[f"conv{li + 1}"] = (w1 * scale, b1 * scale + shift, w2, b2)
    params["lin1"] = _linear_init(ks[6], dim_h, dim_h)
    params["lin2"] = _linear_init(ks[7], dim_h, 1)
    return params


# ----------------------------------------------------------------------------
# Forward pass
# ----------------------------------------------------------------------------

def gin_forward(x, edge_index, batch, params, num_graphs):
    n, in_dim = x.shape
    dim_h = params["conv1"][2].shape[1]

    dh_pad = _round_up(max(dim_h, 128), 128)     # lane-dense hidden width
    f_pad = _round_up(max(in_dim, 128), 128)
    g_pad = _round_up(max(num_graphs, 32), 32)   # int8 pool: 32-sublane alignment
    out_pad = 128                                # lane-dense classifier store

    n_pad_small = _round_up(max(n, 128), 128)
    use_fused = _fused_fits(n_pad_small, f_pad, dh_pad, g_pad)
    n_pad = n_pad_small if use_fused else _round_up(n, 512)

    # --- graph structure (dense; int8 storage, 0/1/2 values are exact) ---
    src, dst = edge_index[0], edge_index[1]
    idx = jnp.arange(n)
    a_hat = jnp.zeros((n_pad, n_pad), jnp.float32)
    a_hat = a_hat.at[dst, src].add(1.0)          # PyG convention: aggregate at dst
    a_hat = a_hat.at[idx, idx].add(1.0)          # + (1+eps)*I, eps=0
    a_hat = a_hat.astype(jnp.int8)

    pool = jnp.zeros((g_pad, n_pad), jnp.float32).at[batch, idx].set(1.0).astype(jnp.int8)

    x_p = jnp.zeros((n_pad, f_pad), jnp.float32).at[:n, :in_dim].set(x).astype(jnp.bfloat16)

    # --- parameters: pad to 128-lane widths; weights bf16, biases f32 ---
    def pw(w, r, c):
        return jnp.zeros((r, c), jnp.float32).at[:w.shape[0], :w.shape[1]].set(w) \
                  .astype(jnp.bfloat16)

    def pb(b, c):
        return jnp.zeros((1, c), jnp.float32).at[:, :b.shape[1]].set(b)

    w11, b11, w12, b12 = params["conv1"]
    w21, b21, w22, b22 = params["conv2"]
    w31, b31, w32, b32 = params["conv3"]
    wl1, bl1 = params["lin1"]
    wl2, bl2 = params["lin2"]

    c1 = (pw(w11, f_pad, dh_pad), pb(b11, dh_pad), pw(w12, dh_pad, dh_pad), pb(b12, dh_pad))
    c2 = (pw(w21, dh_pad, dh_pad), pb(b21, dh_pad), pw(w22, dh_pad, dh_pad), pb(b22, dh_pad))
    c3 = (pw(w31, dh_pad, dh_pad), pb(b31, dh_pad), pw(w32, dh_pad, dh_pad), pb(b32, dh_pad))
    head = (pw(wl1, dh_pad, dh_pad), pb(bl1, dh_pad), pw(wl2, dh_pad, out_pad), pb(bl2, out_pad))

    if use_fused:
        # Small-graph path: one kernel launch, A_hat and H stay in VMEM throughout.
        out = fused_gin(a_hat, x_p, (c1, c2, c3), pool, head, g_pad, out_pad)
        return out[:num_graphs, :1]

    # Big-graph path: tiled A_hat @ H reduction per layer, H resident in VMEM.
    tm = tk = 512
    if n_pad // tm < 2:            # v7x megacore: keep the "parallel" axis >= 2
        tm = max(128, n_pad // 2)
    h = gin_conv_layer(a_hat, x_p, *c1, tm=tm, tk=tk)
    h = gin_conv_layer(a_hat, h, *c2, tm=tm, tk=tk)
    h = gin_conv_layer(a_hat, h, *c3, tm=tm, tk=tk)
    out = pool_head(pool, h, *head, tk=tk)
    return out[:num_graphs, :1]


# ----------------------------------------------------------------------------
# Example
# ----------------------------------------------------------------------------

if __name__ == "__main__":
    key = jax.random.PRNGKey(0)
    k_x, k_p = jax.random.split(key)

    dim_h = 32
    num_graphs = 2
    nodes_per_graph = 8
    n = num_graphs * nodes_per_graph          # 16 nodes
    in_dim = 11                                # GIN first layer expects 11 input features

    # node features [N, 11]
    x = jax.random.normal(k_x, (n, in_dim), jnp.float32)

    # deterministic edge_index: a bidirectional ring within each graph
    src_list, dst_list = [], []
    for g in range(num_graphs):
        base = g * nodes_per_graph
        for i in range(nodes_per_graph):
            a_node = base + i
            b_node = base + (i + 1) % nodes_per_graph
            src_list += [a_node, b_node]
            dst_list += [b_node, a_node]
    edge_index = jnp.array([src_list, dst_list], dtype=jnp.int32)   # [2, 32]

    # graph assignment vector [N]
    batch = jnp.repeat(jnp.arange(num_graphs, dtype=jnp.int32), nodes_per_graph)

    params = init_gin_params(k_p, dim_h, in_dim)

    out = gin_forward(x, edge_index, batch, params, num_graphs)
    out = jax.block_until_ready(out)
    assert out.shape == (num_graphs, 1)
    print("KERNEL_OK")
</pallas_src>

<mosaic_0001>
module attributes {stable_mosaic.version = 11 : i64} {
  func.func @fused_gin_kernel(%arg0: memref<128x128xi8, #tpu.memory_space<vmem>>, %arg1: memref<128x128xbf16, #tpu.memory_space<vmem>>, %arg2: memref<128x128xbf16, #tpu.memory_space<vmem>>, %arg3: memref<1x128xf32, #tpu.memory_space<vmem>>, %arg4: memref<128x128xbf16, #tpu.memory_space<vmem>>, %arg5: memref<1x128xf32, #tpu.memory_space<vmem>>, %arg6: memref<128x128xbf16, #tpu.memory_space<vmem>>, %arg7: memref<1x128xf32, #tpu.memory_space<vmem>>, %arg8: memref<128x128xbf16, #tpu.memory_space<vmem>>, %arg9: memref<1x128xf32, #tpu.memory_space<vmem>>, %arg10: memref<128x128xbf16, #tpu.memory_space<vmem>>, %arg11: memref<1x128xf32, #tpu.memory_space<vmem>>, %arg12: memref<128x128xbf16, #tpu.memory_space<vmem>>, %arg13: memref<1x128xf32, #tpu.memory_space<vmem>>, %arg14: memref<32x128xi8, #tpu.memory_space<vmem>>, %arg15: memref<128x128xbf16, #tpu.memory_space<vmem>>, %arg16: memref<1x128xf32, #tpu.memory_space<vmem>>, %arg17: memref<128x128xbf16, #tpu.memory_space<vmem>>, %arg18: memref<1x128xf32, #tpu.memory_space<vmem>>, %arg19: memref<32x128xf32, #tpu.memory_space<vmem>>) attributes {dimension_semantics = [], scalar_prefetch = 0 : i64, scratch_operands = 0 : i64, tpu.core_type = #tpu.core_type<tc>} {
    %c0 = arith.constant 0 : index
    %c0_0 = arith.constant 0 : index
    %0 = vector.load %arg0[%c0, %c0_0] : memref<128x128xi8, #tpu.memory_space<vmem>>, vector<128x128xi8>
    %1 = arith.sitofp %0 : vector<128x128xi8> to vector<128x128xbf16>
    %c0_1 = arith.constant 0 : index
    %c0_2 = arith.constant 0 : index
    %2 = vector.load %arg1[%c0_1, %c0_2] : memref<128x128xbf16, #tpu.memory_space<vmem>>, vector<128x128xbf16>
    %cst = arith.constant dense<0.000000e+00> : vector<128x128xf32>
    %3 = tpu.matmul %1, %2, %cst {dimension_numbers = #tpu.dot_dimension_numbers<[1], [0], [0], [1], [0, 0, 1, 1], [], []>} : vector<128x128xbf16>, vector<128x128xbf16>, vector<128x128xf32> -> vector<128x128xf32>
    %4 = arith.truncf %3 : vector<128x128xf32> to vector<128x128xbf16>
    %c0_3 = arith.constant 0 : index
    %c0_4 = arith.constant 0 : index
    %5 = vector.load %arg2[%c0_3, %c0_4] : memref<128x128xbf16, #tpu.memory_space<vmem>>, vector<128x128xbf16>
    %cst_5 = arith.constant dense<0.000000e+00> : vector<128x128xf32>
    %6 = tpu.matmul %4, %5, %cst_5 {dimension_numbers = #tpu.dot_dimension_numbers<[1], [0], [0], [1], [0, 0, 1, 1], [], []>} : vector<128x128xbf16>, vector<128x128xbf16>, vector<128x128xf32> -> vector<128x128xf32>
    %c0_6 = arith.constant 0 : index
    %c0_7 = arith.constant 0 : index
    %7 = vector.load %arg3[%c0_6, %c0_7] : memref<1x128xf32, #tpu.memory_space<vmem>>, vector<1x128xf32>
    %8 = vector.broadcast %7 : vector<1x128xf32> to vector<128x128xf32>
    %9 = arith.addf %6, %8 : vector<128x128xf32>
    %cst_8 = arith.constant 0.000000e+00 : f32
    %10 = vector.broadcast %cst_8 : f32 to vector<128x128xf32>
    %11 = arith.maximumf %9, %10 : vector<128x128xf32>
    %12 = arith.truncf %11 : vector<128x128xf32> to vector<128x128xbf16>
    %c0_9 = arith.constant 0 : index
    %c0_10 = arith.constant 0 : index
    %13 = vector.load %arg4[%c0_9, %c0_10] : memref<128x128xbf16, #tpu.memory_space<vmem>>, vector<128x128xbf16>
    %cst_11 = arith.constant dense<0.000000e+00> : vector<128x128xf32>
    %14 = tpu.matmul %12, %13, %cst_11 {dimension_numbers = #tpu.dot_dimension_numbers<[1], [0], [0], [1], [0, 0, 1, 1], [], []>} : vector<128x128xbf16>, vector<128x128xbf16>, vector<128x128xf32> -> vector<128x128xf32>
    %c0_12 = arith.constant 0 : index
    %c0_13 = arith.constant 0 : index
    %15 = vector.load %arg5[%c0_12, %c0_13] : memref<1x128xf32, #tpu.memory_space<vmem>>, vector<1x128xf32>
    %16 = vector.broadcast %15 : vector<1x128xf32> to vector<128x128xf32>
    %17 = arith.addf %14, %16 : vector<128x128xf32>
    %cst_14 = arith.constant 0.000000e+00 : f32
    %18 = vector.broadcast %cst_14 : f32 to vector<128x128xf32>
    %19 = arith.maximumf %17, %18 : vector<128x128xf32>
    %20 = arith.truncf %19 : vector<128x128xf32> to vector<128x128xbf16>
    %cst_15 = arith.constant dense<0.000000e+00> : vector<128x128xf32>
    %21 = tpu.matmul %1, %20, %cst_15 {dimension_numbers = #tpu.dot_dimension_numbers<[1], [0], [0], [1], [0, 0, 1, 1], [], []>} : vector<128x128xbf16>, vector<128x128xbf16>, vector<128x128xf32> -> vector<128x128xf32>
    %22 = arith.truncf %21 : vector<128x128xf32> to vector<128x128xbf16>
    %c0_16 = arith.constant 0 : index
    %c0_17 = arith.constant 0 : index
    %23 = vector.load %arg6[%c0_16, %c0_17] : memref<128x128xbf16, #tpu.memory_space<vmem>>, vector<128x128xbf16>
    %cst_18 = arith.constant dense<0.000000e+00> : vector<128x128xf32>
    %24 = tpu.matmul %22, %23, %cst_18 {dimension_numbers = #tpu.dot_dimension_numbers<[1], [0], [0], [1], [0, 0, 1, 1], [], []>} : vector<128x128xbf16>, vector<128x128xbf16>, vector<128x128xf32> -> vector<128x128xf32>
    %c0_19 = arith.constant 0 : index
    %c0_20 = arith.constant 0 : index
    %25 = vector.load %arg7[%c0_19, %c0_20] : memref<1x128xf32, #tpu.memory_space<vmem>>, vector<1x128xf32>
    %26 = vector.broadcast %25 : vector<1x128xf32> to vector<128x128xf32>
    %27 = arith.addf %24, %26 : vector<128x128xf32>
    %cst_21 = arith.constant 0.000000e+00 : f32
    %28 = vector.broadcast %cst_21 : f32 to vector<128x128xf32>
    %29 = arith.maximumf %27, %28 : vector<128x128xf32>
    %30 = arith.truncf %29 : vector<128x128xf32> to vector<128x128xbf16>
    %c0_22 = arith.constant 0 : index
    %c0_23 = arith.constant 0 : index
    %31 = vector.load %arg8[%c0_22, %c0_23] : memref<128x128xbf16, #tpu.memory_space<vmem>>, vector<128x128xbf16>
    %cst_24 = arith.constant dense<0.000000e+00> : vector<128x128xf32>
    %32 = tpu.matmul %30, %31, %cst_24 {dimension_numbers = #tpu.dot_dimension_numbers<[1], [0], [0], [1], [0, 0, 1, 1], [], []>} : vector<128x128xbf16>, vector<128x128xbf16>, vector<128x128xf32> -> vector<128x128xf32>
    %c0_25 = arith.constant 0 : index
    %c0_26 = arith.constant 0 : index
    %33 = vector.load %arg9[%c0_25, %c0_26] : memref<1x128xf32, #tpu.memory_space<vmem>>, vector<1x128xf32>
    %34 = vector.broadcast %33 : vector<1x128xf32> to vector<128x128xf32>
    %35 = arith.addf %32, %34 : vector<128x128xf32>
    %cst_27 = arith.constant 0.000000e+00 : f32
    %36 = vector.broadcast %cst_27 : f32 to vector<128x128xf32>
    %37 = arith.maximumf %35, %36 : vector<128x128xf32>
    %38 = arith.truncf %37 : vector<128x128xf32> to vector<128x128xbf16>
    %cst_28 = arith.constant dense<0.000000e+00> : vector<128x128xf32>
    %39 = tpu.matmul %1, %38, %cst_28 {dimension_numbers = #tpu.dot_dimension_numbers<[1], [0], [0], [1], [0, 0, 1, 1], [], []>} : vector<128x128xbf16>, vector<128x128xbf16>, vector<128x128xf32> -> vector<128x128xf32>
    %40 = arith.truncf %39 : vector<128x128xf32> to vector<128x128xbf16>
    %c0_29 = arith.constant 0 : index
    %c0_30 = arith.constant 0 : index
    %41 = vector.load %arg10[%c0_29, %c0_30] : memref<128x128xbf16, #tpu.memory_space<vmem>>, vector<128x128xbf16>
    %cst_31 = arith.constant dense<0.000000e+00> : vector<128x128xf32>
    %42 = tpu.matmul %40, %41, %cst_31 {dimension_numbers = #tpu.dot_dimension_numbers<[1], [0], [0], [1], [0, 0, 1, 1], [], []>} : vector<128x128xbf16>, vector<128x128xbf16>, vector<128x128xf32> -> vector<128x128xf32>
    %c0_32 = arith.constant 0 : index
    %c0_33 = arith.constant 0 : index
    %43 = vector.load %arg11[%c0_32, %c0_33] : memref<1x128xf32, #tpu.memory_space<vmem>>, vector<1x128xf32>
    %44 = vector.broadcast %43 : vector<1x128xf32> to vector<128x128xf32>
    %45 = arith.addf %42, %44 : vector<128x128xf32>
    %cst_34 = arith.constant 0.000000e+00 : f32
    %46 = vector.broadcast %cst_34 : f32 to vector<128x128xf32>
    %47 = arith.maximumf %45, %46 : vector<128x128xf32>
    %48 = arith.truncf %47 : vector<128x128xf32> to vector<128x128xbf16>
    %c0_35 = arith.constant 0 : index
    %c0_36 = arith.constant 0 : index
    %49 = vector.load %arg12[%c0_35, %c0_36] : memref<128x128xbf16, #tpu.memory_space<vmem>>, vector<128x128xbf16>
    %cst_37 = arith.constant dense<0.000000e+00> : vector<128x128xf32>
    %50 = tpu.matmul %48, %49, %cst_37 {dimension_numbers = #tpu.dot_dimension_numbers<[1], [0], [0], [1], [0, 0, 1, 1], [], []>} : vector<128x128xbf16>, vector<128x128xbf16>, vector<128x128xf32> -> vector<128x128xf32>
    %c0_38 = arith.constant 0 : index
    %c0_39 = arith.constant 0 : index
    %51 = vector.load %arg13[%c0_38, %c0_39] : memref<1x128xf32, #tpu.memory_space<vmem>>, vector<1x128xf32>
    %52 = vector.broadcast %51 : vector<1x128xf32> to vector<128x128xf32>
    %53 = arith.addf %50, %52 : vector<128x128xf32>
    %cst_40 = arith.constant 0.000000e+00 : f32
    %54 = vector.broadcast %cst_40 : f32 to vector<128x128xf32>
    %55 = arith.maximumf %53, %54 : vector<128x128xf32>
    %56 = arith.truncf %55 : vector<128x128xf32> to vector<128x128xbf16>
    %c0_41 = arith.constant 0 : index
    %c0_42 = arith.constant 0 : index
    %57 = vector.load %arg14[%c0_41, %c0_42] : memref<32x128xi8, #tpu.memory_space<vmem>>, vector<32x128xi8>
    %58 = arith.sitofp %57 : vector<32x128xi8> to vector<32x128xbf16>
    %cst_43 = arith.constant dense<0.000000e+00> : vector<32x128xf32>
    %59 = tpu.matmul %58, %56, %cst_43 {dimension_numbers = #tpu.dot_dimension_numbers<[1], [0], [0], [1], [0, 0, 1, 1], [], []>} : vector<32x128xbf16>, vector<128x128xbf16>, vector<32x128xf32> -> vector<32x128xf32>
    %60 = arith.truncf %59 : vector<32x128xf32> to vector<32x128xbf16>
    %c0_44 = arith.constant 0 : index
    %c0_45 = arith.constant 0 : index
    %61 = vector.load %arg15[%c0_44, %c0_45] : memref<128x128xbf16, #tpu.memory_space<vmem>>, vector<128x128xbf16>
    %cst_46 = arith.constant dense<0.000000e+00> : vector<32x128xf32>
    %62 = tpu.matmul %60, %61, %cst_46 {dimension_numbers = #tpu.dot_dimension_numbers<[1], [0], [0], [1], [0, 0, 1, 1], [], []>} : vector<32x128xbf16>, vector<128x128xbf16>, vector<32x128xf32> -> vector<32x128xf32>
    %c0_47 = arith.constant 0 : index
    %c0_48 = arith.constant 0 : index
    %63 = vector.load %arg16[%c0_47, %c0_48] : memref<1x128xf32, #tpu.memory_space<vmem>>, vector<1x128xf32>
    %64 = vector.broadcast %63 : vector<1x128xf32> to vector<32x128xf32>
    %65 = arith.addf %62, %64 : vector<32x128xf32>
    %cst_49 = arith.constant 0.000000e+00 : f32
    %66 = vector.broadcast %cst_49 : f32 to vector<32x128xf32>
    %67 = arith.maximumf %65, %66 : vector<32x128xf32>
    %68 = arith.truncf %67 : vector<32x128xf32> to vector<32x128xbf16>
    %c0_50 = arith.constant 0 : index
    %c0_51 = arith.constant 0 : index
    %69 = vector.load %arg17[%c0_50, %c0_51] : memref<128x128xbf16, #tpu.memory_space<vmem>>, vector<128x128xbf16>
    %cst_52 = arith.constant dense<0.000000e+00> : vector<32x128xf32>
    %70 = tpu.matmul %68, %69, %cst_52 {dimension_numbers = #tpu.dot_dimension_numbers<[1], [0], [0], [1], [0, 0, 1, 1], [], []>} : vector<32x128xbf16>, vector<128x128xbf16>, vector<32x128xf32> -> vector<32x128xf32>
    %c0_53 = arith.constant 0 : index
    %c0_54 = arith.constant 0 : index
    %71 = vector.load %arg18[%c0_53, %c0_54] : memref<1x128xf32, #tpu.memory_space<vmem>>, vector<1x128xf32>
    %72 = vector.broadcast %71 : vector<1x128xf32> to vector<32x128xf32>
    %73 = arith.addf %70, %72 : vector<32x128xf32>
    %c0_55 = arith.constant 0 : index
    %c0_56 = arith.constant 0 : index
    %74 = vector.load %arg19[%c0_55, %c0_56] : memref<32x128xf32, #tpu.memory_space<vmem>>, vector<32x128xf32>
    tpu.vector_store %arg19[%c0_55, %c0_56], %73 {strides = array<i32>} : memref<32x128xf32, #tpu.memory_space<vmem>>, vector<32x128xf32>,
    return
  }
}

</mosaic_0001>

<bundles_post_ra>
// kernel: tpu_custom_call.1
= control target key start
LH: loop header
LB: loop body
LE: loop exit
PB: predicated region body
PF: predicated region fallthrough
CT: control target
= control target key end

     0   :  { %s3701_s0 = inlined_call_operand.hbm [shape: s8[128,128], index: 0, kind: input, shape index: {}]   ;;  %s3702_s1 = inlined_call_operand.hbm [shape: bf16[128,128], index: 1, kind: input, shape index: {}]   ;;  %s3703_s2 = inlined_call_operand.hbm [shape: bf16[128,128], index: 2, kind: input, shape index: {}]   ;;  %s3704_s3 = inlined_call_operand.hbm [shape: f32[1,128], index: 3, kind: input, shape index: {}]   ;;  %s3705_s4 = inlined_call_operand.hbm [shape: bf16[128,128], index: 4, kind: input, shape index: {}]   ;;  %s3706_s5 = inlined_call_operand.hbm [shape: f32[1,128], index: 5, kind: input, shape index: {}]   ;;  %s3707_s6 = inlined_call_operand.hbm [shape: bf16[128,128], index: 6, kind: input, shape index: {}]   ;;  %s3708_s7 = inlined_call_operand.hbm [shape: f32[1,128], index: 7, kind: input, shape index: {}]   ;;  %s3709_s8 = inlined_call_operand.hbm [shape: bf16[128,128], index: 8, kind: input, shape index: {}]   ;;  %s3710_s9 = inlined_call_operand.hbm [shape: f32[1,128], index: 9, kind: input, shape index: {}]   ;;  %s3711_s10 = inlined_call_operand.hbm [shape: bf16[128,128], index: 10, kind: input, shape index: {}]   ;;  %s3712_s11 = inlined_call_operand.hbm [shape: f32[1,128], index: 11, kind: input, shape index: {}]   ;;  %s3713_s12 = inlined_call_operand.hbm [shape: bf16[128,128], index: 12, kind: input, shape index: {}]   ;;  %s3714_s13 = inlined_call_operand.hbm [shape: f32[1,128], index: 13, kind: input, shape index: {}]   ;;  %s3715_s14 = inlined_call_operand.hbm [shape: s8[32,128], index: 14, kind: input, shape index: {}]   ;;  %s3716_s15 = inlined_call_operand.hbm [shape: bf16[128,128], index: 15, kind: input, shape index: {}]   ;;  %s3717_s16 = inlined_call_operand.hbm [shape: f32[1,128], index: 16, kind: input, shape index: {}]   ;;  %s3718_s17 = inlined_call_operand.vmem [shape: bf16[128,128], index: 17, kind: input, shape index: {}]   ;;  %s3719_s18 = inlined_call_operand.vmem [shape: f32[1,128], index: 18, kind: input, shape index: {}]   ;;  %s3720_s19 = inlined_call_operand.hbm [shape: f32[32,128], index: 19, kind: output, shape index: {}]  }
   0x1   :  { %3727 = sst [smem:[#allocation40_spill]] %s3701_s0 }
   0x2   :  { %3728 = sst [smem:[#allocation41_spill]] %s3702_s1 }
   0x3   :  { %3729 = sst [smem:[#allocation42_spill]] %s3703_s2 }
   0x4   :  { %3730 = sst [smem:[#allocation43_spill]] %s3704_s3 }
   0x5   :  { %3731 = sst [smem:[#allocation44_spill]] %s3718_s17 }
   0x6   :  { %3732 = sst [smem:[#allocation45_spill]] %s3719_s18 }
   0x7   :  { %3733 = sst [smem:[#allocation46_spill]] %s3720_s19 }
   0x8   :  { %24 = vsyncpa [#allocation3], 0 }
   0x9   :  { %25 = vsyncpa [#allocation6], 0 }
   0xa   :  { %26 = vsyncpa [#allocation9], 0 }
   0xb   :  { %27 = vsyncpa [#allocation12], 0 }
   0xc   :  { %28 = vsyncpa [#allocation15], 0 }
   0xd   :  { %29 = vsyncpa [#allocation18], 0 }
   0xe   :  { %30 = vsyncpa [#allocation21], 0 }
   0xf   :  { %31 = vsyncpa [#allocation24], 0 }
  0x10   :  { %32 = vsyncpa [#allocation27], 0 }
  0x11   :  { %33 = vsyncpa [#allocation4], 0  ;;  %s3262_s0 = smov [#allocation5]   ;;  %s3734_s1 = sld [smem:[#allocation41_spill]] }
  0x12   :  { %s51_s30 = sshll.u32 %s3262_s0, 4  ;;  %s52_s30 = int_to_ptr.vmem [resolvable:$true] %s51_s30 }
  0x17   :  { %s2846_s22 = scalar_lea.hbm %s3734_s1, 1024 }
  0x18   :  { %p2847_p0 = scmp.ne.s32.totalorder %s3734_s1, %s2846_s22  ;;  %p2850_p1 = scmp.lt.u32.totalorder %s2846_s22, %s3734_s1 }
  0x1a   :  { %p2852_p2 = pnand %p2850_p1, %p2847_p0 }
  0x1c   :  { %2855 = shalt.err (!%p2852_p2)
}
  0x1d   :  { %s2856_s3 = scalar_lea.vmem %s52_s30, 1024  ;;  %p2861_p4 = scmp.lt.s32.totalorder %s52_s30, %s52_s30 }
  0x1e   :  { %p2857_p3 = scmp.ne.s32.totalorder %s52_s30, %s2856_s3  ;;  %p2862_p5 = scmp.lt.s32.totalorder %s2856_s3, %s2856_s3 }
  0x20   :  { %p2863_p6 = por %p2862_p5, %p2861_p4 }
  0x22   :  { %p2864_p7 = pnand %p2863_p6, %p2857_p3 }
  0x24   :  { %2867 = shalt.err (!%p2864_p7)
}
  0x25   :  { %s3263_s26 = smov 64   ;;  %s3264_s27 = smov 4  }
  0x26   :  { %57 = dma.hbm_to_vmem [thread:$0]  %s3734_s1, 1024, %s52_s30, [#allocation6], %s3263_s26, %s3263_s26, %s3264_s27  }
  0x27   :  { %s3265_s0 = smov [#allocation8]   ;;  %s3266_s21 = smov [#allocation11]  }
  0x28   :  { %s76_s20 = sshll.u32 %s3265_s0, 4  ;;  %s98_s22 = sshll.u32 %s3266_s21, 4  ;;  %s77_s20 = int_to_ptr.vmem [resolvable:$true] %s76_s20  ;;  %s99_s22 = int_to_ptr.vmem [resolvable:$true] %s98_s22 }
  0x29   :  { %s3735_s24 = sld [smem:[#allocation43_spill]] }
  0x2f   :  { %s2868_s25 = scalar_lea.hbm %s3735_s24, 16 }
  0x30   :  { %p2869_p8 = scmp.ne.s32.totalorder %s3735_s24, %s2868_s25  ;;  %p2872_p9 = scmp.lt.u32.totalorder %s2868_s25, %s3735_s24 }
  0x32   :  { %p2874_p10 = pnand %p2872_p9, %p2869_p8 }
  0x34   :  { %2877 = shalt.err (!%p2874_p10)
}
  0x35   :  { %s2878_s30 = scalar_lea.vmem %s77_s20, 16  ;;  %s2882_s1 = scalar_lea.vmem %s77_s20, 32 }
  0x36   :  { %p2879_p11 = scmp.ne.s32.totalorder %s77_s20, %s2878_s30  ;;  %p2883_p12 = scmp.lt.s32.totalorder %s77_s20, %s77_s20 }
  0x37   :  { %p2884_p13 = scmp.lt.s32.totalorder %s2882_s1, %s2878_s30 }
  0x39   :  { %p2885_p0 = por %p2884_p13, %p2883_p12 }
  0x3b   :  { %p2886_p1 = pnand %p2885_p0, %p2879_p11 }
  0x3d   :  { %2889 = shalt.err (!%p2886_p1)
}
  0x3e   :  { %79 = dma.hbm_to_vmem [thread:$0]  %s3735_s24, 16, %s77_s20, [#allocation9]  }
  0x3f   :  { %s2890_s17 = scalar_lea.hbm %s3706_s5, 16 }
  0x40   :  { %p2891_p2 = scmp.ne.s32.totalorder %s3706_s5, %s2890_s17  ;;  %p2894_p3 = scmp.lt.u32.totalorder %s2890_s17, %s3706_s5 }
  0x42   :  { %p2896_p4 = pnand %p2894_p3, %p2891_p2 }
  0x44   :  { %2899 = shalt.err (!%p2896_p4)
}
  0x45   :  { %s2900_s25 = scalar_lea.vmem %s99_s22, 16  ;;  %s2904_s3 = scalar_lea.vmem %s99_s22, 32 }
  0x46   :  { %p2901_p5 = scmp.ne.s32.totalorder %s99_s22, %s2900_s25  ;;  %p2905_p6 = scmp.lt.s32.totalorder %s99_s22, %s99_s22 }
  0x47   :  { %p2906_p7 = scmp.lt.s32.totalorder %s2904_s3, %s2900_s25 }
  0x49   :  { %p2907_p8 = por %p2906_p7, %p2905_p6 }
  0x4b   :  { %p2908_p9 = pnand %p2907_p8, %p2901_p5 }
  0x4d   :  { %2911 = shalt.err (!%p2908_p9)
}
  0x4e   :  { %101 = dma.hbm_to_vmem [thread:$0]  %s3706_s5, 16, %s99_s22, [#allocation12]  }
  0x4f   :  { %s3267_s30 = smov [#allocation14]   ;;  %s3268_s28 = smov [#allocation17]  }
  0x50   :  { %s120_s1 = sshll.u32 %s3267_s30, 4  ;;  %s142_s29 = sshll.u32 %s3268_s28, 4  ;;  %s121_s1 = int_to_ptr.vmem [resolvable:$true] %s120_s1  ;;  %s143_s29 = int_to_ptr.vmem [resolvable:$true] %s142_s29 }
  0x51   :  { %s2912_s17 = scalar_lea.hbm %s3708_s7, 16 }
  0x52   :  { %p2913_p10 = scmp.ne.s32.totalorder %s3708_s7, %s2912_s17  ;;  %p2916_p11 = scmp.lt.u32.totalorder %s2912_s17, %s3708_s7 }
  0x54   :  { %p2918_p12 = pnand %p2916_p11, %p2913_p10 }
  0x56   :  { %2921 = shalt.err (!%p2918_p12)
}
  0x57   :  { %s2922_s5 = scalar_lea.vmem %s121_s1, 16  ;;  %s2926_s22 = scalar_lea.vmem %s121_s1, 32 }
  0x58   :  { %p2923_p13 = scmp.ne.s32.totalorder %s121_s1, %s2922_s5  ;;  %p2927_p0 = scmp.lt.s32.totalorder %s121_s1, %s121_s1 }
  0x59   :  { %p2928_p1 = scmp.lt.s32.totalorder %s2926_s22, %s2922_s5 }
  0x5b   :  { %p2929_p2 = por %p2928_p1, %p2927_p0 }
  0x5d   :  { %p2930_p3 = pnand %p2929_p2, %p2923_p13 }
  0x5f   :  { %2933 = shalt.err (!%p2930_p3)
}
  0x60   :  { %123 = dma.hbm_to_vmem [thread:$0]  %s3708_s7, 16, %s121_s1, [#allocation15]  }
  0x61   :  { %s2934_s30 = scalar_lea.hbm %s3710_s9, 16 }
  0x62   :  { %p2935_p4 = scmp.ne.s32.totalorder %s3710_s9, %s2934_s30  ;;  %p2938_p5 = scmp.lt.u32.totalorder %s2934_s30, %s3710_s9 }
  0x64   :  { %p2940_p6 = pnand %p2938_p5, %p2935_p4 }
  0x66   :  { %2943 = shalt.err (!%p2940_p6)
}
  0x67   :  { %s2944_s18 = scalar_lea.vmem %s143_s29, 16  ;;  %s2948_s21 = scalar_lea.vmem %s143_s29, 32 }
  0x68   :  { %p2945_p7 = scmp.ne.s32.totalorder %s143_s29, %s2944_s18  ;;  %p2949_p8 = scmp.lt.s32.totalorder %s143_s29, %s143_s29 }
  0x69   :  { %p2950_p9 = scmp.lt.s32.totalorder %s2948_s21, %s2944_s18 }
  0x6b   :  { %p2951_p10 = por %p2950_p9, %p2949_p8 }
  0x6d   :  { %p2952_p11 = pnand %p2951_p10, %p2945_p7 }
  0x6f   :  { %2955 = shalt.err (!%p2952_p11)
}
  0x70   :  { %145 = dma.hbm_to_vmem [thread:$0]  %s3710_s9, 16, %s143_s29, [#allocation18]  }
  0x71   :  { %s3269_s2 = smov [#allocation20]   ;;  %s3270_s5 = smov [#allocation23]  }
  0x72   :  { %s164_s23 = sshll.u32 %s3269_s2, 4  ;;  %s186_s22 = sshll.u32 %s3270_s5, 4  ;;  %s165_s23 = int_to_ptr.vmem [resolvable:$true] %s164_s23  ;;  %s187_s22 = int_to_ptr.vmem [resolvable:$true] %s186_s22 }
  0x73   :  { %s2956_s20 = scalar_lea.hbm %s3712_s11, 16 }
  0x74   :  { %p2957_p12 = scmp.ne.s32.totalorder %s3712_s11, %s2956_s20  ;;  %p2960_p13 = scmp.lt.u32.totalorder %s2956_s20, %s3712_s11 }
  0x76   :  { %p2962_p0 = pnand %p2960_p13, %p2957_p12 }
  0x78   :  { %2965 = shalt.err (!%p2962_p0)
}
  0x79   :  { %s2966_s9 = scalar_lea.vmem %s165_s23, 16  ;;  %s2970_s29 = scalar_lea.vmem %s165_s23, 32 }
  0x7a   :  { %p2967_p1 = scmp.ne.s32.totalorder %s165_s23, %s2966_s9  ;;  %p2971_p2 = scmp.lt.s32.totalorder %s165_s23, %s165_s23 }
  0x7b   :  { %p2972_p3 = scmp.lt.s32.totalorder %s2970_s29, %s2966_s9 }
  0x7d   :  { %p2973_p4 = por %p2972_p3, %p2971_p2 }
  0x7f   :  { %p2974_p5 = pnand %p2973_p4, %p2967_p1 }
  0x81   :  { %2977 = shalt.err (!%p2974_p5)
}
  0x82   :  { %167 = dma.hbm_to_vmem [thread:$0]  %s3712_s11, 16, %s165_s23, [#allocation21]  }
  0x83   :  { %s2978_s7 = scalar_lea.hbm %s3714_s13, 16 }
  0x84   :  { %p2979_p6 = scmp.ne.s32.totalorder %s3714_s13, %s2978_s7  ;;  %p2982_p7 = scmp.lt.u32.totalorder %s2978_s7, %s3714_s13 }
  0x86   :  { %p2984_p8 = pnand %p2982_p7, %p2979_p6 }
  0x88   :  { %2987 = shalt.err (!%p2984_p8)
}
  0x89   :  { %s2988_s3 = scalar_lea.vmem %s187_s22, 16  ;;  %s2992_s20 = scalar_lea.vmem %s187_s22, 32 }
  0x8a   :  { %p2989_p9 = scmp.ne.s32.totalorder %s187_s22, %s2988_s3  ;;  %p2993_p10 = scmp.lt.s32.totalorder %s187_s22, %s187_s22 }
  0x8b   :  { %p2994_p11 = scmp.lt.s32.totalorder %s2992_s20, %s2988_s3 }
  0x8d   :  { %p2995_p12 = por %p2994_p11, %p2993_p10 }
  0x8f   :  { %p2996_p13 = pnand %p2995_p12, %p2989_p9 }
  0x91   :  { %2999 = shalt.err (!%p2996_p13)
}
  0x92   :  { %189 = dma.hbm_to_vmem [thread:$0]  %s3714_s13, 16, %s187_s22, [#allocation24]  }
  0x93   :  { %s3271_s24 = smov [#allocation26]   ;;  %s3272_s28 = smov [#allocation2]  }
  0x94   :  { %s205_s30 = sshll.u32 %s3271_s24, 4  ;;  %s39_s19 = sshll.u32 %s3272_s28, 4  ;;  %s206_s30 = int_to_ptr.vmem [resolvable:$true] %s205_s30  ;;  %s40_s19 = int_to_ptr.vmem [resolvable:$true] %s39_s19 }
  0x95   :  { %s3000_s0 = scalar_lea.hbm %s3716_s15, 1024 }
  0x96   :  { %p3001_p0 = scmp.ne.s32.totalorder %s3716_s15, %s3000_s0  ;;  %p3004_p1 = scmp.lt.u32.totalorder %s3000_s0, %s3716_s15 }
  0x98   :  { %p3006_p2 = pnand %p3004_p1, %p3001_p0 }
  0x9a   :  { %3009 = shalt.err (!%p3006_p2)
}
  0x9b   :  { %s3010_s13 = scalar_lea.vmem %s206_s30, 1024  ;;  %p3015_p4 = scmp.lt.s32.totalorder %s206_s30, %s206_s30 }
  0x9c   :  { %p3011_p3 = scmp.ne.s32.totalorder %s206_s30, %s3010_s13  ;;  %p3016_p5 = scmp.lt.s32.totalorder %s3010_s13, %s3010_s13 }
  0x9e   :  { %p3017_p6 = por %p3016_p5, %p3015_p4 }
  0xa0   :  { %p3018_p7 = pnand %p3017_p6, %p3011_p3 }
  0xa2   :  { %3021 = shalt.err (!%p3018_p7)
}
  0xa3   :  { %211 = dma.hbm_to_vmem [thread:$0]  %s3716_s15, 1024, %s206_s30, [#allocation27], %s3263_s26, %s3263_s26, %s3264_s27  }
  0xa4   :  { %s3736_s25 = sld [smem:[#allocation40_spill]] }
  0xaa   :  { %s3022_s3 = scalar_lea.hbm %s3736_s25, 512 }
  0xab   :  { %p3023_p8 = scmp.ne.s32.totalorder %s3736_s25, %s3022_s3  ;;  %p3026_p9 = scmp.lt.u32.totalorder %s3022_s3, %s3736_s25 }
  0xad   :  { %p3028_p10 = pnand %p3026_p9, %p3023_p8 }
  0xaf   :  { %3031 = shalt.err (!%p3028_p10)
}
  0xb0   :  { %s3032_s28 = scalar_lea.vmem %s40_s19, 512  ;;  %p3037_p12 = scmp.lt.s32.totalorder %s40_s19, %s40_s19 }
  0xb1   :  { %p3033_p11 = scmp.ne.s32.totalorder %s40_s19, %s3032_s28  ;;  %p3038_p13 = scmp.lt.s32.totalorder %s3032_s28, %s3032_s28 }
  0xb3   :  { %p3039_p0 = por %p3038_p13, %p3037_p12 }
  0xb5   :  { %p3040_p1 = pnand %p3039_p0, %p3033_p11 }
  0xb7   :  { %3043 = shalt.err (!%p3040_p1)
}
  0xb8   :  { %s3273_s15 = smov 128   ;;  %s3274_s30 = smov 8  }
  0xb9   :  { %45 = dma.hbm_to_vmem [thread:$0]  %s3736_s25, 512, %s40_s19, [#allocation3], %s3273_s15, %s3273_s15, %s3274_s30  }
  0xba   :  { %s3275_s0 = smov [#allocation7]   ;;  %s3276_s18 = smov [#allocation10]  }
  0xbb   :  { %s63_s17 = sshll.u32 %s3275_s0, 4  ;;  %s85_s21 = sshll.u32 %s3276_s18, 4  ;;  %s64_s17 = int_to_ptr.vmem [resolvable:$true] %s63_s17  ;;  %s86_s21 = int_to_ptr.vmem [resolvable:$true] %s85_s21 }
  0xbc   :  { %s3737_s22 = sld [smem:[#allocation42_spill]] }
  0xc2   :  { %s3044_s1 = scalar_lea.hbm %s3737_s22, 1024 }
  0xc3   :  { %p3045_p2 = scmp.ne.s32.totalorder %s3737_s22, %s3044_s1  ;;  %p3048_p3 = scmp.lt.u32.totalorder %s3044_s1, %s3737_s22 }
  0xc5   :  { %p3050_p4 = pnand %p3048_p3, %p3045_p2 }
  0xc7   :  { %3053 = shalt.err (!%p3050_p4)
}
  0xc8   :  { %s3054_s19 = scalar_lea.vmem %s64_s17, 1024  ;;  %p3059_p6 = scmp.lt.s32.totalorder %s64_s17, %s64_s17 }
  0xc9   :  { %p3055_p5 = scmp.ne.s32.totalorder %s64_s17, %s3054_s19  ;;  %p3060_p7 = scmp.lt.s32.totalorder %s3054_s19, %s3054_s19 }
  0xcb   :  { %p3061_p8 = por %p3060_p7, %p3059_p6 }
  0xcd   :  { %p3062_p9 = pnand %p3061_p8, %p3055_p5 }
  0xcf   :  { %3065 = shalt.err (!%p3062_p9)
}
  0xd0   :  { %69 = dma.hbm_to_vmem [thread:$0]  %s3737_s22, 1024, %s64_s17, [#allocation6], %s3263_s26, %s3263_s26, %s3264_s27  }
  0xd1   :  { %s3066_s28 = scalar_lea.hbm %s3705_s4, 1024 }
  0xd2   :  { %p3067_p10 = scmp.ne.s32.totalorder %s3705_s4, %s3066_s28  ;;  %p3070_p11 = scmp.lt.u32.totalorder %s3066_s28, %s3705_s4 }
  0xd4   :  { %p3072_p12 = pnand %p3070_p11, %p3067_p10 }
  0xd6   :  { %3075 = shalt.err (!%p3072_p12)
}
  0xd7   :  { %s3076_s7 = scalar_lea.vmem %s86_s21, 1024  ;;  %p3081_p0 = scmp.lt.s32.totalorder %s86_s21, %s86_s21 }
  0xd8   :  { %p3077_p13 = scmp.ne.s32.totalorder %s86_s21, %s3076_s7  ;;  %p3082_p1 = scmp.lt.s32.totalorder %s3076_s7, %s3076_s7 }
  0xda   :  { %p3083_p2 = por %p3082_p1, %p3081_p0 }
  0xdc   :  { %p3084_p3 = pnand %p3083_p2, %p3077_p13 }
  0xde   :  { %3087 = shalt.err (!%p3084_p3)
}
  0xdf   :  { %91 = dma.hbm_to_vmem [thread:$0]  %s3705_s4, 1024, %s86_s21, [#allocation9], %s3263_s26, %s3263_s26, %s3264_s27  }
  0xe0   :  { %s3277_s22 = smov [#allocation13]   ;;  %s3278_s2 = smov [#allocation16]  }
  0xe1   :  { %s107_s1 = sshll.u32 %s3277_s22, 4  ;;  %s129_s5 = sshll.u32 %s3278_s2, 4  ;;  %s108_s1 = int_to_ptr.vmem [resolvable:$true] %s107_s1  ;;  %s130_s5 = int_to_ptr.vmem [resolvable:$true] %s129_s5 }
  0xe2   :  { %s3088_s19 = scalar_lea.hbm %s3707_s6, 1024 }
  0xe3   :  { %p3089_p4 = scmp.ne.s32.totalorder %s3707_s6, %s3088_s19  ;;  %p3092_p5 = scmp.lt.u32.totalorder %s3088_s19, %s3707_s6 }
  0xe5   :  { %p3094_p6 = pnand %p3092_p5, %p3089_p4 }
  0xe7   :  { %3097 = shalt.err (!%p3094_p6)
}
  0xe8   :  { %s3098_s4 = scalar_lea.vmem %s108_s1, 1024  ;;  %p3103_p8 = scmp.lt.s32.totalorder %s108_s1, %s108_s1 }
  0xe9   :  { %p3099_p7 = scmp.ne.s32.totalorder %s108_s1, %s3098_s4  ;;  %p3104_p9 = scmp.lt.s32.totalorder %s3098_s4, %s3098_s4 }
  0xeb   :  { %p3105_p10 = por %p3104_p9, %p3103_p8 }
  0xed   :  { %p3106_p11 = pnand %p3105_p10, %p3099_p7 }
  0xef   :  { %3109 = shalt.err (!%p3106_p11)
}
  0xf0   :  { %113 = dma.hbm_to_vmem [thread:$0]  %s3707_s6, 1024, %s108_s1, [#allocation12], %s3263_s26, %s3263_s26, %s3264_s27  }
  0xf1   :  { %s3110_s0 = scalar_lea.hbm %s3709_s8, 1024 }
  0xf2   :  { %p3111_p12 = scmp.ne.s32.totalorder %s3709_s8, %s3110_s0  ;;  %p3114_p13 = scmp.lt.u32.totalorder %s3110_s0, %s3709_s8 }
  0xf4   :  { %p3116_p0 = pnand %p3114_p13, %p3111_p12 }
  0xf6   :  { %3119 = shalt.err (!%p3116_p0)
}
  0xf7   :  { %s3120_s22 = scalar_lea.vmem %s130_s5, 1024  ;;  %p3125_p2 = scmp.lt.s32.totalorder %s130_s5, %s130_s5 }
  0xf8   :  { %p3121_p1 = scmp.ne.s32.totalorder %s130_s5, %s3120_s22  ;;  %p3126_p3 = scmp.lt.s32.totalorder %s3120_s22, %s3120_s22 }
  0xfa   :  { %p3127_p4 = por %p3126_p3, %p3125_p2 }
  0xfc   :  { %p3128_p5 = pnand %p3127_p4, %p3121_p1 }
  0xfe   :  { %3131 = shalt.err (!%p3128_p5)
}
  0xff   :  { %135 = dma.hbm_to_vmem [thread:$0]  %s3709_s8, 1024, %s130_s5, [#allocation15], %s3263_s26, %s3263_s26, %s3264_s27  }
 0x100   :  { %s3279_s2 = smov [#allocation19]   ;;  %s3280_s20 = smov [#allocation22]  }
 0x101   :  { %s151_s3 = sshll.u32 %s3279_s2, 4  ;;  %s173_s19 = sshll.u32 %s3280_s20, 4  ;;  %s152_s3 = int_to_ptr.vmem [resolvable:$true] %s151_s3  ;;  %s174_s19 = int_to_ptr.vmem [resolvable:$true] %s173_s19 }
 0x102   :  { %s3132_s23 = scalar_lea.hbm %s3711_s10, 1024 }
 0x103   :  { %p3133_p6 = scmp.ne.s32.totalorder %s3711_s10, %s3132_s23  ;;  %p3136_p7 = scmp.lt.u32.totalorder %s3132_s23, %s3711_s10 }
 0x105   :  { %p3138_p8 = pnand %p3136_p7, %p3133_p6 }
 0x107   :  { %3141 = shalt.err (!%p3138_p8)
}
 0x108   :  { %s3142_s8 = scalar_lea.vmem %s152_s3, 1024  ;;  %p3147_p10 = scmp.lt.s32.totalorder %s152_s3, %s152_s3 }
 0x109   :  { %p3143_p9 = scmp.ne.s32.totalorder %s152_s3, %s3142_s8  ;;  %p3148_p11 = scmp.lt.s32.totalorder %s3142_s8, %s3142_s8 }
 0x10b   :  { %p3149_p12 = por %p3148_p11, %p3147_p10 }
 0x10d   :  { %p3150_p13 = pnand %p3149_p12, %p3143_p9 }
 0x10f   :  { %3153 = shalt.err (!%p3150_p13)
}
 0x110   :  { %157 = dma.hbm_to_vmem [thread:$0]  %s3711_s10, 1024, %s152_s3, [#allocation18], %s3263_s26, %s3263_s26, %s3264_s27  }
 0x111   :  { %s3154_s18 = scalar_lea.hbm %s3713_s12, 1024 }
 0x112   :  { %p3155_p0 = scmp.ne.s32.totalorder %s3713_s12, %s3154_s18  ;;  %p3158_p1 = scmp.lt.u32.totalorder %s3154_s18, %s3713_s12 }
 0x114   :  { %p3160_p2 = pnand %p3158_p1, %p3155_p0 }
 0x116   :  { %3163 = shalt.err (!%p3160_p2)
}
 0x117   :  { %s3164_s6 = scalar_lea.vmem %s174_s19, 1024  ;;  %p3169_p4 = scmp.lt.s32.totalorder %s174_s19, %s174_s19 }
 0x118   :  { %p3165_p3 = scmp.ne.s32.totalorder %s174_s19, %s3164_s6  ;;  %p3170_p5 = scmp.lt.s32.totalorder %s3164_s6, %s3164_s6 }
 0x11a   :  { %p3171_p6 = por %p3170_p5, %p3169_p4 }
 0x11c   :  { %p3172_p7 = pnand %p3171_p6, %p3165_p3 }
 0x11e   :  { %3175 = shalt.err (!%p3172_p7)
}
 0x11f   :  { %179 = dma.hbm_to_vmem [thread:$0]  %s3713_s12, 1024, %s174_s19, [#allocation21], %s3263_s26, %s3263_s26, %s3264_s27  }
 0x120   :  { %s3281_s2 = smov [#allocation25]   ;;  %s3282_s20 = smov [#allocation28]  }
 0x121   :  { %s196_s3 = sshll.u32 %s3281_s2, 4  ;;  %s218_s25 = sshll.u32 %s3282_s20, 4  ;;  %s197_s3 = int_to_ptr.vmem [resolvable:$true] %s196_s3  ;;  %s219_s25 = int_to_ptr.vmem [resolvable:$true] %s218_s25 }
 0x122   :  { %s3176_s24 = scalar_lea.hbm %s3715_s14, 128 }
 0x123   :  { %p3177_p8 = scmp.ne.s32.totalorder %s3715_s14, %s3176_s24  ;;  %p3180_p9 = scmp.lt.u32.totalorder %s3176_s24, %s3715_s14 }
 0x125   :  { %p3182_p10 = pnand %p3180_p9, %p3177_p8 }
 0x127   :  { %3185 = shalt.err (!%p3182_p10)
}
 0x128   :  { %s3186_s12 = scalar_lea.vmem %s197_s3, 128  ;;  %p3191_p12 = scmp.lt.s32.totalorder %s197_s3, %s197_s3 }
 0x129   :  { %p3187_p11 = scmp.ne.s32.totalorder %s197_s3, %s3186_s12  ;;  %p3192_p13 = scmp.lt.s32.totalorder %s3186_s12, %s3186_s12 }
 0x12b   :  { %p3193_p0 = por %p3192_p13, %p3191_p12 }
 0x12d   :  { %p3194_p1 = pnand %p3193_p0, %p3187_p11 }
 0x12f   :  { %3197 = shalt.err (!%p3194_p1)
}
 0x130   :  { %199 = dma.hbm_to_vmem [thread:$0]  %s3715_s14, 128, %s197_s3, [#allocation24]  }
 0x131   :  { %s3198_s9 = scalar_lea.hbm %s3717_s16, 16 }
 0x132   :  { %p3199_p2 = scmp.ne.s32.totalorder %s3717_s16, %s3198_s9  ;;  %p3202_p3 = scmp.lt.u32.totalorder %s3198_s9, %s3717_s16 }
 0x134   :  { %p3204_p4 = pnand %p3202_p3, %p3199_p2 }
 0x136   :  { %3207 = shalt.err (!%p3204_p4)
}
 0x137   :  { %s3208_s17 = scalar_lea.vmem %s219_s25, 16  ;;  %s3212_s13 = scalar_lea.vmem %s219_s25, 32 }
 0x138   :  { %p3209_p5 = scmp.ne.s32.totalorder %s219_s25, %s3208_s17  ;;  %p3213_p6 = scmp.lt.s32.totalorder %s219_s25, %s219_s25 }
 0x139   :  { %p3214_p7 = scmp.lt.s32.totalorder %s3212_s13, %s3208_s17 }
 0x13b   :  { %p3215_p8 = por %p3214_p7, %p3213_p6 }
 0x13d   :  { %p3216_p9 = pnand %p3215_p8, %p3209_p5 }
 0x13f   :  { %3219 = shalt.err (!%p3216_p9)
}
 0x140   :  { %221 = dma.hbm_to_vmem [thread:$0]  %s3717_s16, 16, %s219_s25, [#allocation27]  }
 0x141   :  { %3242 = dma.done.wait [#allocation3], 512  }
 0x142   :  { %3243 = vsyncadd [#allocation3], 4294966784 }
 0x143   :  { %3244 = dma.done.wait [#allocation6], 2048  }
 0x144   :  { %3245 = vsyncadd [#allocation6], 4294965248 }
 0x145   :  { %3246 = dma.done.wait [#allocation9], 1040  }
 0x146   :  { %3247 = vsyncadd [#allocation9], 4294966256 }
 0x147   :  { %3248 = dma.done.wait [#allocation12], 1040  }
 0x148   :  { %3249 = vsyncadd [#allocation12], 4294966256 }
 0x149   :  { %3250 = dma.done.wait [#allocation15], 1040  }
 0x14a   :  { %3251 = vsyncadd [#allocation15], 4294966256 }
 0x14b   :  { %3252 = dma.done.wait [#allocation18], 1040  }
 0x14c   :  { %3253 = vsyncadd [#allocation18], 4294966256 }
 0x14d   :  { %3254 = dma.done.wait [#allocation21], 1040  }
 0x14e   :  { %3255 = vsyncadd [#allocation21], 4294966256 }
 0x14f   :  { %3256 = dma.done.wait [#allocation24], 144  }
 0x150   :  { %3257 = vsyncadd [#allocation24], 4294967152 }
 0x151   :  { %3258 = dma.done.wait [#allocation27], 1040  }
 0x152   :  { %3259 = vsyncadd [#allocation27], 4294966256  ;;  %v2774_v0 = vld [vmem:[#allocation5] sm:$0xff]   ;;  %v2775_v1 = vld [vmem:[#allocation5 + $0x8] sm:$0xff]   ;;  %s3738_s10 = sld [smem:[#allocation44_spill]]  ;;  %s3739_s5 = sld [smem:[#allocation45_spill]] }
 0x153   :  { %2404 = vmatprep.subr.bf16.mxu0 %v2774_v0  ;;  %v2776_v2 = vld [vmem:[#allocation5 + $0x10] sm:$0xff]   ;;  %v2777_v3 = vld [vmem:[#allocation5 + $0x18] sm:$0xff]   ;;  %v278_v4 = vld [vmem:[#allocation2] sm:$0xff]  ;;  %s3283_s9 = smov [#allocation29]  }
 0x154   :  { %2405 = vmatpush3.bf16.msra.mxu0 %v2774_v0  ;;  %v3615_v5 = vunpack.c.l.s8.bf16 %v278_v4  ;;  %v2782_v6 = vld [vmem:[#allocation7] sm:$0xff]   ;;  %v2783_v7 = vld [vmem:[#allocation7 + $0x8] sm:$0xff]   ;;  %v2784_v9 = vld [vmem:[#allocation7 + $0x10] sm:$0xff]   ;;  %v3618_v18 = vunpack.c.h.s8.bf16 %v278_v4  ;;  %s2130_s29 = sshll.u32 %s3283_s9, 4  ;;  %s2131_s29 = int_to_ptr.vmem [resolvable:$true] %s2130_s29 }
 0x155   :  { %2406 = vmatprep.subr.bf16.mxu0 %v2775_v1  ;;  %v2778_v8 = vld [vmem:[#allocation5 + $0x20] sm:$0xff]   ;;  %2436 = vmatprep.subr.bf16.mxu1 %v2782_v6  ;;  %v2779_v10 = vld [vmem:[#allocation5 + $0x28] sm:$0xff]   ;;  %v2785_v11 = vld [vmem:[#allocation7 + $0x18] sm:$0xff]   ;;  %s3220_s0 = scalar_lea.vmem %s2131_s29, 512  ;;  %p3225_p11 = scmp.lt.s32.totalorder %s2131_s29, %s2131_s29 }
 0x156   :  { %2420 = vmatprep.mubr.bf16.mxu0 %v3615_v5  ;;  %2437 = vmatpush3.bf16.msra.mxu1 %v2782_v6  ;;  %v2780_v12 = vld [vmem:[#allocation5 + $0x30] sm:$0xff]   ;;  %v2786_v13 = vld [vmem:[#allocation7 + $0x20] sm:$0xff]   ;;  %v2781_v14 = vld [vmem:[#allocation5 + $0x38] sm:$0xff]   ;;  %p3221_p10 = scmp.ne.s32.totalorder %s2131_s29, %s3220_s0  ;;  %p3226_p12 = scmp.lt.s32.totalorder %s3220_s0, %s3220_s0 }
 0x157   :  { %2438 = vmatprep.subr.bf16.mxu1 %v2783_v7  ;;  %v2787_v15 = vld [vmem:[#allocation7 + $0x28] sm:$0xff]   ;;  %v2788_v17 = vld [vmem:[#allocation7 + $0x30] sm:$0xff]   ;;  %v281_v23 = vld [vmem:[#allocation2 + $0x18] sm:$0xff] }
 0x158   :  { %2407 = vmatpush3.bf16.msra.mxu0 %v2775_v1  ;;  %v279_v16 = vld [vmem:[#allocation2 + $0x8] sm:$0xff]  ;;  %v280_v20 = vld [vmem:[#allocation2 + $0x10] sm:$0xff]  ;;  %v3632_v25 = vunpack.c.l.s8.bf16 %v281_v23  ;;  %v3636_v26 = vunpack.c.h.s8.bf16 %v281_v23  ;;  %v2789_v27 = vld [vmem:[#allocation7 + $0x38] sm:$0xff]   ;;  %p3227_p13 = por %p3226_p12, %p3225_p11 }
 0x159   :  { %2408 = vmatprep.subr.bf16.mxu0 %v2776_v2  ;;  %v3620_v19 = vunpack.c.l.s8.bf16 %v279_v16  ;;  %v3624_v21 = vunpack.c.h.s8.bf16 %v279_v16  ;;  %v3626_v22 = vunpack.c.l.s8.bf16 %v280_v20  ;;  %v3630_v24 = vunpack.c.h.s8.bf16 %v280_v20  ;;  %v2790_v28 = vld [vmem:[#allocation10] sm:$0xff]   ;;  %v2791_v29 = vld [vmem:[#allocation10 + $0x8] sm:$0xff]   ;;  %v2792_v30 = vld [vmem:[#allocation10 + $0x10] sm:$0xff]  }
 0x15a   :  { %2439 = vmatpush3.bf16.msra.mxu1 %v2783_v7  ;;  %v2793_v31 = vld [vmem:[#allocation10 + $0x18] sm:$0xff]   ;;  %v2794_v32 = vld [vmem:[#allocation10 + $0x20] sm:$0xff]   ;;  %v2795_v33 = vld [vmem:[#allocation10 + $0x28] sm:$0xff]   ;;  %p3228_p0 = pnand %p3227_p13, %p3221_p10 }
 0x15b   :  { %2440 = vmatprep.subr.bf16.mxu1 %v2784_v9  ;;  %v2796_v58 = vld [vmem:[#allocation10 + $0x30] sm:$0xff]   ;;  %v2797_v59 = vld [vmem:[#allocation10 + $0x38] sm:$0xff]  }
 0x15c   :  { %2409 = vmatpush3.bf16.msra.mxu0 %v2776_v2  ;;  %v2158_v60 = vld [vmem:[#allocation8] ss:$0 sm:$0xff] }
 0x15d   :  { %2410 = vmatprep.subr.bf16.mxu0 %v2777_v3 }
 0x15e   :  { %2441 = vmatpush3.bf16.msra.mxu1 %v2784_v9 }
 0x15f   :  { %2442 = vmatprep.subr.bf16.mxu1 %v2785_v11 }
 0x160   :  { %2411 = vmatpush3.bf16.msra.mxu0 %v2777_v3 }
 0x161   :  { %2412 = vmatprep.subr.bf16.mxu0 %v2778_v8 }
 0x162   :  { %2443 = vmatpush3.bf16.msra.mxu1 %v2785_v11 }
 0x163   :  { %2444 = vmatprep.subr.bf16.mxu1 %v2786_v13 }
 0x164   :  { %2413 = vmatpush3.bf16.msra.mxu0 %v2778_v8 }
 0x165   :  { %2414 = vmatprep.subr.bf16.mxu0 %v2779_v10 }
 0x166   :  { %2445 = vmatpush3.bf16.msra.mxu1 %v2786_v13 }
 0x167   :  { %2446 = vmatprep.subr.bf16.mxu1 %v2787_v15 }
 0x168   :  { %2415 = vmatpush3.bf16.msra.mxu0 %v2779_v10 }
 0x169   :  { %2416 = vmatprep.subr.bf16.mxu0 %v2780_v12 }
 0x16a   :  { %2447 = vmatpush3.bf16.msra.mxu1 %v2787_v15 }
 0x16b   :  { %2448 = vmatprep.subr.bf16.mxu1 %v2788_v17 }
 0x16c   :  { %2417 = vmatpush3.bf16.msra.mxu0 %v2780_v12 }
 0x16d   :  { %2418 = vmatprep.subr.bf16.mxu0 %v2781_v14 }
 0x16e   :  { %2449 = vmatpush3.bf16.msra.mxu1 %v2788_v17 }
 0x16f   :  { %2450 = vmatprep.subr.bf16.mxu1 %v2789_v27 }
 0x170   :  { %2419 = vmatpush3.bf16.msra.mxu0 %v2781_v14 }
 0x171   :  { %2468 = vmatprep.subr.bf16.mxu0 %v2790_v28 }
 0x172   :  { %2451 = vmatpush3.bf16.msra.mxu1 %v2789_v27 }
 0x173   :  { %2421 = vmatmul.mubr.bf16.vlgmr.msra.gmra.mrb[0].mxu0 %v3618_v18 }
 0x174   :  { %2424 = vmatprep.mubr.bf16.mxu0 %v3620_v19  ;;  %2469 = vmatpush3.bf16.msra.mxu0 %v2790_v28 }
 0x175   :  { %2470 = vmatprep.subr.bf16.mxu0 %v2791_v29 }
 0x178   :  { %2471 = vmatpush3.bf16.msra.mxu0 %v2791_v29 }
 0x179   :  { %2472 = vmatprep.subr.bf16.mxu0 %v2792_v30 }
 0x17b   :  { %2425 = vmatmul.mubr.bf16.gmra.mrb[4].mxu0 %v3624_v21 }
 0x17c   :  { %2428 = vmatprep.mubr.bf16.mxu0 %v3626_v22  ;;  %2473 = vmatpush3.bf16.msra.mxu0 %v2792_v30 }
 0x17d   :  { %2474 = vmatprep.subr.bf16.mxu0 %v2793_v31 }
 0x180   :  { %2475 = vmatpush3.bf16.msra.mxu0 %v2793_v31 }
 0x181   :  { %2476 = vmatprep.subr.bf16.mxu0 %v2794_v32 }
 0x183   :  { %2429 = vmatmul.mubr.bf16.gmra.mrb[8].mxu0 %v3630_v24 }
 0x184   :  { %2432 = vmatprep.mubr.bf16.mxu0 %v3632_v25  ;;  %2477 = vmatpush3.bf16.msra.mxu0 %v2794_v32 }
 0x185   :  { %2478 = vmatprep.subr.bf16.mxu0 %v2795_v33 }
 0x188   :  { %2479 = vmatpush3.bf16.msra.mxu0 %v2795_v33 }
 0x189   :  { %2480 = vmatprep.subr.bf16.mxu0 %v2796_v58 }
 0x18b   :  { %2433 = vmatmul.mubr.bf16.gmra.mrb[12].mxu0 %v3636_v26 }
 0x18c   :  { %2481 = vmatpush3.bf16.msra.mxu0 %v2796_v58 }
 0x18d   :  { %2482 = vmatprep.subr.bf16.mxu0 %v2797_v59 }
 0x190   :  { %2483 = vmatpush3.bf16.msra.mxu0 %v2797_v59 }
 0x246   :  { %v2422_v34 = vpop.f32.mrb[0].mxu0 }
 0x247   :  { %v388_v35 = vpop.f32.mrb[1].mxu0 }
 0x248   :  { %v2423_v36 = vpop.f32.mrb[2].mxu0 }
 0x249   :  { %v452_v37 = vpack.c.bf16 %v2423_v36, %v2422_v34  ;;  %v391_v38 = vpop.f32.mrb[3].mxu0 }
 0x24a   :  { %v451_v39 = vpack.c.bf16 %v391_v38, %v388_v35 }
 0x24c   :  { %2452 = vmatprep.mubr.bf16.mxu1 %v451_v39 }
 0x24d   :  { %2453 = vmatmul.mubr.bf16.vlgmr.msra.gmra.mrb[0].mxu1 %v452_v37 }
 0x24e   :  { %v2426_v40 = vpop.f32.mrb[4].mxu0 }
 0x24f   :  { %v404_v41 = vpop.f32.mrb[5].mxu0 }
 0x250   :  { %v2427_v42 = vpop.f32.mrb[6].mxu0 }
 0x251   :  { %v454_v43 = vpack.c.bf16 %v2427_v42, %v2426_v40  ;;  %v407_v44 = vpop.f32.mrb[7].mxu0 }
 0x252   :  { %v453_v45 = vpack.c.bf16 %v407_v44, %v404_v41 }
 0x254   :  { %2456 = vmatprep.mubr.bf16.mxu1 %v453_v45 }
 0x255   :  { %2457 = vmatmul.mubr.bf16.gmra.mrb[4].mxu1 %v454_v43 }
 0x256   :  { %v2430_v46 = vpop.f32.mrb[8].mxu0 }
 0x257   :  { %v420_v47 = vpop.f32.mrb[9].mxu0 }
 0x258   :  { %v2431_v48 = vpop.f32.mrb[10].mxu0 }
 0x259   :  { %v456_v49 = vpack.c.bf16 %v2431_v48, %v2430_v46  ;;  %v423_v50 = vpop.f32.mrb[11].mxu0 }
 0x25a   :  { %v455_v51 = vpack.c.bf16 %v423_v50, %v420_v47 }
 0x25c   :  { %2460 = vmatprep.mubr.bf16.mxu1 %v455_v51 }
 0x25d   :  { %2461 = vmatmul.mubr.bf16.gmra.mrb[8].mxu1 %v456_v49 }
 0x25e   :  { %v2434_v52 = vpop.f32.mrb[12].mxu0 }
 0x25f   :  { %v436_v53 = vpop.f32.mrb[13].mxu0 }
 0x260   :  { %v2435_v54 = vpop.f32.mrb[14].mxu0 }
 0x261   :  { %v458_v55 = vpack.c.bf16 %v2435_v54, %v2434_v52  ;;  %v439_v56 = vpop.f32.mrb[15].mxu0 }
 0x262   :  { %v457_v57 = vpack.c.bf16 %v439_v56, %v436_v53 }
 0x264   :  { %2464 = vmatprep.mubr.bf16.mxu1 %v457_v57 }
 0x265   :  { %2465 = vmatmul.mubr.bf16.gmra.mrb[12].mxu1 %v458_v55 }
 0x266   :  { %2516 = vmatprep.mubr.bf16.mxu1 %v3615_v5 }
 0x320   :  { %v2454_v61 = vpop.f32.mrb[0].mxu1 }
 0x321   :  { %v573_v62 = vadd.f32 %v2454_v61, %v2158_v60  ;;  %v564_v63 = vpop.f32.mrb[1].mxu1 }
 0x322   :  { %v565_v0 = vadd.f32 %v2158_v60, %v564_v63  ;;  %v2455_v1 = vpop.f32.mrb[2].mxu1  ;;  %v2799_v63 = vld [vmem:[#allocation13 + $0x8] sm:$0xff]  }
 0x323   :  { %v576_v2 = vadd.f32 %v2455_v1, %v2158_v60  ;;  %v567_v3 = vpop.f32.mrb[3].mxu1  ;;  %v629_v6 = vmax.f32 %v573_v62, 0.0  ;;  %v2798_v62 = vld [vmem:[#allocation13] sm:$0xff]   ;;  %v2801_v1 = vld [vmem:[#allocation13 + $0x18] sm:$0xff]  }
 0x324   :  { %v568_v4 = vadd.f32 %v2158_v60, %v567_v3  ;;  %v627_v8 = vmax.f32 %v565_v0, 0.0  ;;  %2532 = vmatprep.subr.bf16.mxu0 %v2798_v62  ;;  %v2800_v0 = vld [vmem:[#allocation13 + $0x10] sm:$0xff]  }
 0x325   :  { %v630_v7 = vmax.f32 %v576_v2, 0.0  ;;  %v2803_v2 = vld [vmem:[#allocation13 + $0x28] sm:$0xff]   ;;  %v2804_v3 = vld [vmem:[#allocation13 + $0x30] sm:$0xff]  }
 0x326   :  { %v628_v9 = vmax.f32 %v568_v4, 0.0  ;;  %v2167_v4 = vld [vmem:[#allocation11] ss:$0 sm:$0xff] }
 0x327   :  { %v644_v10 = vpack.c.bf16 %v630_v7, %v629_v6 }
 0x328   :  { %v643_v11 = vpack.c.bf16 %v628_v9, %v627_v8  ;;  %v2458_v12 = vpop.f32.mrb[4].mxu1 }
 0x329   :  { %v589_v13 = vadd.f32 %v2458_v12, %v2158_v60  ;;  %v580_v14 = vpop.f32.mrb[5].mxu1 }
 0x32a   :  { %v581_v15 = vadd.f32 %v2158_v60, %v580_v14  ;;  %v2459_v16 = vpop.f32.mrb[6].mxu1  ;;  %2484 = vmatprep.mubr.bf16.mxu0 %v643_v11 }
 0x32b   :  { %v592_v17 = vadd.f32 %v2459_v16, %v2158_v60  ;;  %v583_v20 = vpop.f32.mrb[7].mxu1  ;;  %2485 = vmatmul.mubr.bf16.vlgmr.msra.gmra.mrb[16].mxu0 %v644_v10  ;;  %v633_v27 = vmax.f32 %v589_v13, 0.0 }
 0x32c   :  { %v584_v23 = vadd.f32 %v2158_v60, %v583_v20  ;;  %v631_v29 = vmax.f32 %v581_v15, 0.0  ;;  %2533 = vmatpush3.bf16.msra.mxu0 %v2798_v62 }
 0x32d   :  { %v634_v28 = vmax.f32 %v592_v17, 0.0  ;;  %2534 = vmatprep.subr.bf16.mxu0 %v2799_v63 }
 0x32e   :  { %v632_v30 = vmax.f32 %v584_v23, 0.0 }
 0x32f   :  { %v646_v31 = vpack.c.bf16 %v634_v28, %v633_v27 }
 0x330   :  { %v645_v32 = vpack.c.bf16 %v632_v30, %v631_v29  ;;  %v2462_v33 = vpop.f32.mrb[8].mxu1  ;;  %2535 = vmatpush3.bf16.msra.mxu0 %v2799_v63 }
 0x331   :  { %v605_v34 = vadd.f32 %v2462_v33, %v2158_v60  ;;  %v596_v35 = vpop.f32.mrb[9].mxu1  ;;  %2536 = vmatprep.subr.bf16.mxu0 %v2800_v0 }
 0x332   :  { %v597_v36 = vadd.f32 %v2158_v60, %v596_v35  ;;  %v2463_v37 = vpop.f32.mrb[10].mxu1  ;;  %2488 = vmatprep.mubr.bf16.mxu0 %v645_v32 }
 0x333   :  { %v608_v38 = vadd.f32 %v2463_v37, %v2158_v60  ;;  %v599_v39 = vpop.f32.mrb[11].mxu1  ;;  %2489 = vmatmul.mubr.bf16.gmra.mrb[20].mxu0 %v646_v31  ;;  %v637_v41 = vmax.f32 %v605_v34, 0.0 }
 0x334   :  { %v600_v40 = vadd.f32 %v2158_v60, %v599_v39  ;;  %v635_v43 = vmax.f32 %v597_v36, 0.0  ;;  %2537 = vmatpush3.bf16.msra.mxu0 %v2800_v0 }
 0x335   :  { %v638_v42 = vmax.f32 %v608_v38, 0.0  ;;  %2538 = vmatprep.subr.bf16.mxu0 %v2801_v1 }
 0x336   :  { %v636_v44 = vmax.f32 %v600_v40, 0.0 }
 0x337   :  { %v648_v45 = vpack.c.bf16 %v638_v42, %v637_v41 }
 0x338   :  { %v647_v46 = vpack.c.bf16 %v636_v44, %v635_v43  ;;  %v2466_v47 = vpop.f32.mrb[12].mxu1  ;;  %2539 = vmatpush3.bf16.msra.mxu0 %v2801_v1 }
 0x339   :  { %v621_v48 = vadd.f32 %v2466_v47, %v2158_v60  ;;  %v612_v49 = vpop.f32.mrb[13].mxu1 }
 0x33a   :  { %v613_v50 = vadd.f32 %v2158_v60, %v612_v49  ;;  %v2467_v51 = vpop.f32.mrb[14].mxu1  ;;  %2492 = vmatprep.mubr.bf16.mxu0 %v647_v46 }
 0x33b   :  { %v624_v52 = vadd.f32 %v2467_v51, %v2158_v60  ;;  %v615_v53 = vpop.f32.mrb[15].mxu1  ;;  %2493 = vmatmul.mubr.bf16.gmra.mrb[24].mxu0 %v648_v45  ;;  %v641_v55 = vmax.f32 %v621_v48, 0.0 }
 0x33c   :  { %v616_v54 = vadd.f32 %v2158_v60, %v615_v53  ;;  %v639_v57 = vmax.f32 %v613_v50, 0.0  ;;  %v2802_v60 = vld [vmem:[#allocation13 + $0x20] sm:$0xff]  }
 0x33d   :  { %v642_v56 = vmax.f32 %v624_v52, 0.0  ;;  %2540 = vmatprep.subr.bf16.mxu0 %v2802_v60 }
 0x33e   :  { %v640_v58 = vmax.f32 %v616_v54, 0.0  ;;  %2541 = vmatpush3.bf16.msra.mxu0 %v2802_v60 }
 0x33f   :  { %v650_v59 = vpack.c.bf16 %v642_v56, %v641_v55  ;;  %2542 = vmatprep.subr.bf16.mxu0 %v2803_v2 }
 0x340   :  { %v649_v61 = vpack.c.bf16 %v640_v58, %v639_v57 }
 0x342   :  { %2496 = vmatprep.mubr.bf16.mxu0 %v649_v61  ;;  %2543 = vmatpush3.bf16.msra.mxu0 %v2803_v2 }
 0x343   :  { %2497 = vmatmul.mubr.bf16.gmra.mrb[28].mxu0 %v650_v59  ;;  %2544 = vmatprep.subr.bf16.mxu0 %v2804_v3 }
 0x346   :  { %2545 = vmatpush3.bf16.msra.mxu0 %v2804_v3 }
 0x3fe   :  { %v2486_v6 = vpop.f32.mrb[16].mxu0 }
 0x3ff   :  { %v765_v7 = vadd.f32 %v2486_v6, %v2167_v4  ;;  %v756_v8 = vpop.f32.mrb[17].mxu0 }
 0x400   :  { %v757_v9 = vadd.f32 %v2167_v4, %v756_v8  ;;  %v2487_v10 = vpop.f32.mrb[18].mxu0  ;;  %v2807_v8 = vld [vmem:[#allocation16 + $0x8] sm:$0xff]  }
 0x401   :  { %v768_v11 = vadd.f32 %v2487_v10, %v2167_v4  ;;  %v759_v12 = vpop.f32.mrb[19].mxu0  ;;  %v821_v14 = vmax.f32 %v765_v7, 0.0  ;;  %v2806_v7 = vld [vmem:[#allocation16] sm:$0xff]   ;;  %v2809_v10 = vld [vmem:[#allocation16 + $0x18] sm:$0xff]  }
 0x402   :  { %v760_v13 = vadd.f32 %v2167_v4, %v759_v12  ;;  %v819_v16 = vmax.f32 %v757_v9, 0.0  ;;  %v2808_v9 = vld [vmem:[#allocation16 + $0x10] sm:$0xff]   ;;  %v2811_v12 = vld [vmem:[#allocation16 + $0x28] sm:$0xff]  }
 0x403   :  { %v822_v15 = vmax.f32 %v768_v11, 0.0  ;;  %v2810_v11 = vld [vmem:[#allocation16 + $0x20] sm:$0xff]  }
 0x404   :  { %v820_v17 = vmax.f32 %v760_v13, 0.0 }
 0x405   :  { %v836_v20 = vpack.c.bf16 %v822_v15, %v821_v14 }
 0x406   :  { %v835_v23 = vpack.c.bf16 %v820_v17, %v819_v16  ;;  %v2490_v27 = vpop.f32.mrb[20].mxu0 }
 0x407   :  { %v781_v28 = vadd.f32 %v2490_v27, %v2167_v4  ;;  %v772_v29 = vpop.f32.mrb[21].mxu0 }
 0x408   :  { %v773_v30 = vadd.f32 %v2167_v4, %v772_v29  ;;  %v2491_v31 = vpop.f32.mrb[22].mxu0  ;;  %2500 = vmatprep.subr.bf16.mxu1 %v835_v23 }
 0x409   :  { %v784_v32 = vadd.f32 %v2491_v31, %v2167_v4  ;;  %v775_v33 = vpop.f32.mrb[23].mxu0  ;;  %2501 = vmatpush3.bf16.msra.mxu1 %v835_v23  ;;  %v825_v35 = vmax.f32 %v781_v28, 0.0 }
 0x40a   :  { %v776_v34 = vadd.f32 %v2167_v4, %v775_v33  ;;  %2502 = vmatprep.subr.bf16.mxu1 %v836_v20  ;;  %v823_v37 = vmax.f32 %v773_v30, 0.0 }
 0x40b   :  { %v826_v36 = vmax.f32 %v784_v32, 0.0 }
 0x40c   :  { %v824_v38 = vmax.f32 %v776_v34, 0.0 }
 0x40d   :  { %v838_v39 = vpack.c.bf16 %v826_v36, %v825_v35  ;;  %2503 = vmatpush3.bf16.msra.mxu1 %v836_v20 }
 0x40e   :  { %v837_v40 = vpack.c.bf16 %v824_v38, %v823_v37  ;;  %v2494_v41 = vpop.f32.mrb[24].mxu0 }
 0x40f   :  { %v797_v42 = vadd.f32 %v2494_v41, %v2167_v4  ;;  %v788_v43 = vpop.f32.mrb[25].mxu0 }
 0x410   :  { %v789_v44 = vadd.f32 %v2167_v4, %v788_v43  ;;  %v2495_v45 = vpop.f32.mrb[26].mxu0  ;;  %2504 = vmatprep.subr.bf16.mxu1 %v837_v40 }
 0x411   :  { %v800_v46 = vadd.f32 %v2495_v45, %v2167_v4  ;;  %v791_v47 = vpop.f32.mrb[27].mxu0  ;;  %2505 = vmatpush3.bf16.msra.mxu1 %v837_v40  ;;  %v829_v49 = vmax.f32 %v797_v42, 0.0  ;;  %v2813_v45 = vld [vmem:[#allocation16 + $0x38] sm:$0xff]  }
 0x412   :  { %v792_v48 = vadd.f32 %v2167_v4, %v791_v47  ;;  %2506 = vmatprep.subr.bf16.mxu1 %v838_v39  ;;  %v827_v51 = vmax.f32 %v789_v44, 0.0  ;;  %v2812_v44 = vld [vmem:[#allocation16 + $0x30] sm:$0xff]  }
 0x413   :  { %v830_v50 = vmax.f32 %v800_v46, 0.0  ;;  %v2176_v46 = vld [vmem:[#allocation14] ss:$0 sm:$0xff] }
 0x414   :  { %v828_v52 = vmax.f32 %v792_v48, 0.0 }
 0x415   :  { %v840_v53 = vpack.c.bf16 %v830_v50, %v829_v49  ;;  %2507 = vmatpush3.bf16.msra.mxu1 %v838_v39 }
 0x416   :  { %v839_v54 = vpack.c.bf16 %v828_v52, %v827_v51  ;;  %v2498_v55 = vpop.f32.mrb[28].mxu0 }
 0x417   :  { %v813_v56 = vadd.f32 %v2498_v55, %v2167_v4  ;;  %v804_v57 = vpop.f32.mrb[29].mxu0 }
 0x418   :  { %v805_v58 = vadd.f32 %v2167_v4, %v804_v57  ;;  %v2499_v59 = vpop.f32.mrb[30].mxu0  ;;  %2508 = vmatprep.subr.bf16.mxu1 %v839_v54 }
 0x419   :  { %v816_v61 = vadd.f32 %v2499_v59, %v2167_v4  ;;  %v807_v62 = vpop.f32.mrb[31].mxu0  ;;  %2509 = vmatpush3.bf16.msra.mxu1 %v839_v54  ;;  %v833_v0 = vmax.f32 %v813_v56, 0.0 }
 0x41a   :  { %v808_v63 = vadd.f32 %v2167_v4, %v807_v62  ;;  %2510 = vmatprep.subr.bf16.mxu1 %v840_v53  ;;  %v831_v60 = vmax.f32 %v805_v58, 0.0  ;;  %v2805_v4 = vld [vmem:[#allocation13 + $0x38] sm:$0xff]  }
 0x41b   :  { %v834_v1 = vmax.f32 %v816_v61, 0.0  ;;  %2546 = vmatprep.subr.bf16.mxu0 %v2805_v4 }
 0x41c   :  { %v832_v2 = vmax.f32 %v808_v63, 0.0  ;;  %2547 = vmatpush3.bf16.msra.mxu0 %v2805_v4 }
 0x41d   :  { %v842_v3 = vpack.c.bf16 %v834_v1, %v833_v0  ;;  %2511 = vmatpush3.bf16.msra.mxu1 %v840_v53 }
 0x41e   :  { %v841_v6 = vpack.c.bf16 %v832_v2, %v831_v60 }
 0x420   :  { %2512 = vmatprep.subr.bf16.mxu1 %v841_v6 }
 0x421   :  { %2513 = vmatpush3.bf16.msra.mxu1 %v841_v6 }
 0x422   :  { %2514 = vmatprep.subr.bf16.mxu1 %v842_v3 }
 0x425   :  { %2515 = vmatpush3.bf16.msra.mxu1 %v842_v3 }
 0x426   :  { %2564 = vmatprep.subr.bf16.mxu1 %v2806_v7 }
 0x428   :  { %2517 = vmatmul.mubr.bf16.vlgmr.msra.gmra.mrb[16].mxu1 %v3618_v18 }
 0x429   :  { %2520 = vmatprep.mubr.bf16.mxu1 %v3620_v19  ;;  %2565 = vmatpush3.bf16.msra.mxu1 %v2806_v7 }
 0x42a   :  { %2566 = vmatprep.subr.bf16.mxu1 %v2807_v8 }
 0x42d   :  { %2567 = vmatpush3.bf16.msra.mxu1 %v2807_v8 }
 0x42e   :  { %2568 = vmatprep.subr.bf16.mxu1 %v2808_v9 }
 0x430   :  { %2521 = vmatmul.mubr.bf16.gmra.mrb[20].mxu1 %v3624_v21 }
 0x431   :  { %2524 = vmatprep.mubr.bf16.mxu1 %v3626_v22  ;;  %2569 = vmatpush3.bf16.msra.mxu1 %v2808_v9 }
 0x432   :  { %2570 = vmatprep.subr.bf16.mxu1 %v2809_v10 }
 0x435   :  { %2571 = vmatpush3.bf16.msra.mxu1 %v2809_v10 }
 0x436   :  { %2572 = vmatprep.subr.bf16.mxu1 %v2810_v11 }
 0x438   :  { %2525 = vmatmul.mubr.bf16.gmra.mrb[24].mxu1 %v3630_v24 }
 0x439   :  { %2528 = vmatprep.mubr.bf16.mxu1 %v3632_v25  ;;  %2573 = vmatpush3.bf16.msra.mxu1 %v2810_v11 }
 0x43a   :  { %2574 = vmatprep.subr.bf16.mxu1 %v2811_v12 }
 0x43d   :  { %2575 = vmatpush3.bf16.msra.mxu1 %v2811_v12 }
 0x43e   :  { %2576 = vmatprep.subr.bf16.mxu1 %v2812_v44 }
 0x440   :  { %2529 = vmatmul.mubr.bf16.gmra.mrb[28].mxu1 %v3636_v26 }
 0x441   :  { %2577 = vmatpush3.bf16.msra.mxu1 %v2812_v44 }
 0x442   :  { %2578 = vmatprep.subr.bf16.mxu1 %v2813_v45 }
 0x445   :  { %2579 = vmatpush3.bf16.msra.mxu1 %v2813_v45 }
 0x4fb   :  { %v2518_v13 = vpop.f32.mrb[16].mxu1 }
 0x4fc   :  { %v877_v14 = vpop.f32.mrb[17].mxu1 }
 0x4fd   :  { %v2519_v15 = vpop.f32.mrb[18].mxu1 }
 0x4fe   :  { %v941_v16 = vpack.c.bf16 %v2519_v15, %v2518_v13  ;;  %v880_v17 = vpop.f32.mrb[19].mxu1 }
 0x4ff   :  { %v940_v20 = vpack.c.bf16 %v880_v17, %v877_v14 }
 0x501   :  { %2548 = vmatprep.mubr.bf16.mxu0 %v940_v20 }
 0x502   :  { %2549 = vmatmul.mubr.bf16.vlgmr.msra.gmra.mrb[32].mxu0 %v941_v16 }
 0x503   :  { %v2522_v23 = vpop.f32.mrb[20].mxu1 }
 0x504   :  { %v893_v27 = vpop.f32.mrb[21].mxu1 }
 0x505   :  { %v2523_v28 = vpop.f32.mrb[22].mxu1 }
 0x506   :  { %v943_v29 = vpack.c.bf16 %v2523_v28, %v2522_v23  ;;  %v896_v30 = vpop.f32.mrb[23].mxu1 }
 0x507   :  { %v942_v31 = vpack.c.bf16 %v896_v30, %v893_v27 }
 0x509   :  { %2552 = vmatprep.mubr.bf16.mxu0 %v942_v31 }
 0x50a   :  { %2553 = vmatmul.mubr.bf16.gmra.mrb[36].mxu0 %v943_v29 }
 0x50b   :  { %v2526_v32 = vpop.f32.mrb[24].mxu1 }
 0x50c   :  { %v909_v33 = vpop.f32.mrb[25].mxu1 }
 0x50d   :  { %v2527_v34 = vpop.f32.mrb[26].mxu1 }
 0x50e   :  { %v945_v35 = vpack.c.bf16 %v2527_v34, %v2526_v32  ;;  %v912_v36 = vpop.f32.mrb[27].mxu1 }
 0x50f   :  { %v944_v37 = vpack.c.bf16 %v912_v36, %v909_v33 }
 0x511   :  { %2556 = vmatprep.mubr.bf16.mxu0 %v944_v37 }
 0x512   :  { %2557 = vmatmul.mubr.bf16.gmra.mrb[40].mxu0 %v945_v35 }
 0x513   :  { %v2530_v38 = vpop.f32.mrb[28].mxu1 }
 0x514   :  { %v925_v39 = vpop.f32.mrb[29].mxu1 }
 0x515   :  { %v2531_v40 = vpop.f32.mrb[30].mxu1 }
 0x516   :  { %v947_v41 = vpack.c.bf16 %v2531_v40, %v2530_v38  ;;  %v928_v42 = vpop.f32.mrb[31].mxu1 }
 0x517   :  { %v946_v43 = vpack.c.bf16 %v928_v42, %v925_v39 }
 0x519   :  { %2560 = vmatprep.mubr.bf16.mxu0 %v946_v43 }
 0x51a   :  { %2561 = vmatmul.mubr.bf16.gmra.mrb[44].mxu0 %v947_v41 }
 0x51b   :  { %2612 = vmatprep.mubr.bf16.mxu0 %v3615_v5 }
 0x5d5   :  { %v2550_v47 = vpop.f32.mrb[32].mxu0 }
 0x5d6   :  { %v1062_v48 = vadd.f32 %v2550_v47, %v2176_v46  ;;  %v1053_v49 = vpop.f32.mrb[33].mxu0  ;;  %v2814_v47 = vld [vmem:[#allocation19] sm:$0xff]  }
 0x5d7   :  { %v1054_v50 = vadd.f32 %v2176_v46, %v1053_v49  ;;  %v2551_v51 = vpop.f32.mrb[34].mxu0  ;;  %2628 = vmatprep.subr.bf16.mxu1 %v2814_v47  ;;  %v2816_v49 = vld [vmem:[#allocation19 + $0x10] sm:$0xff]  }
 0x5d8   :  { %v1065_v52 = vadd.f32 %v2551_v51, %v2176_v46  ;;  %v1056_v53 = vpop.f32.mrb[35].mxu0  ;;  %v1118_v55 = vmax.f32 %v1062_v48, 0.0  ;;  %v2815_v48 = vld [vmem:[#allocation19 + $0x8] sm:$0xff]  }
 0x5d9   :  { %v1057_v54 = vadd.f32 %v2176_v46, %v1056_v53  ;;  %v1116_v57 = vmax.f32 %v1054_v50, 0.0  ;;  %v2817_v50 = vld [vmem:[#allocation19 + $0x18] sm:$0xff]   ;;  %v2819_v51 = vld [vmem:[#allocation19 + $0x28] sm:$0xff]  }
 0x5da   :  { %v1119_v56 = vmax.f32 %v1065_v52, 0.0  ;;  %v2820_v52 = vld [vmem:[#allocation19 + $0x30] sm:$0xff]   ;;  %v2185_v53 = vld [vmem:[#allocation17] ss:$0 sm:$0xff] }
 0x5db   :  { %v1117_v58 = vmax.f32 %v1057_v54, 0.0 }
 0x5dc   :  { %v1133_v5 = vpack.c.bf16 %v1119_v56, %v1118_v55 }
 0x5dd   :  { %v1132_v59 = vpack.c.bf16 %v1117_v58, %v1116_v57  ;;  %v2554_v61 = vpop.f32.mrb[36].mxu0 }
 0x5de   :  { %v1078_v62 = vadd.f32 %v2554_v61, %v2176_v46  ;;  %v1069_v63 = vpop.f32.mrb[37].mxu0 }
 0x5df   :  { %v1070_v0 = vadd.f32 %v2176_v46, %v1069_v63  ;;  %v2555_v1 = vpop.f32.mrb[38].mxu0  ;;  %2580 = vmatprep.mubr.bf16.mxu1 %v1132_v59 }
 0x5e0   :  { %v1081_v60 = vadd.f32 %v2555_v1, %v2176_v46  ;;  %v1072_v2 = vpop.f32.mrb[39].mxu0  ;;  %2581 = vmatmul.mubr.bf16.vlgmr.msra.gmra.mrb[32].mxu1 %v1133_v5  ;;  %v1122_v6 = vmax.f32 %v1078_v62, 0.0 }
 0x5e1   :  { %v1073_v3 = vadd.f32 %v2176_v46, %v1072_v2  ;;  %v1120_v7 = vmax.f32 %v1070_v0, 0.0  ;;  %2629 = vmatpush3.bf16.msra.mxu1 %v2814_v47 }
 0x5e2   :  { %v1123_v4 = vmax.f32 %v1081_v60, 0.0  ;;  %2630 = vmatprep.subr.bf16.mxu1 %v2815_v48 }
 0x5e3   :  { %v1121_v8 = vmax.f32 %v1073_v3, 0.0 }
 0x5e4   :  { %v1135_v9 = vpack.c.bf16 %v1123_v4, %v1122_v6 }
 0x5e5   :  { %v1134_v10 = vpack.c.bf16 %v1121_v8, %v1120_v7  ;;  %v2558_v11 = vpop.f32.mrb[40].mxu0  ;;  %2631 = vmatpush3.bf16.msra.mxu1 %v2815_v48 }
 0x5e6   :  { %v1094_v12 = vadd.f32 %v2558_v11, %v2176_v46  ;;  %v1085_v13 = vpop.f32.mrb[41].mxu0  ;;  %2632 = vmatprep.subr.bf16.mxu1 %v2816_v49 }
 0x5e7   :  { %v1086_v14 = vadd.f32 %v2176_v46, %v1085_v13  ;;  %v2559_v15 = vpop.f32.mrb[42].mxu0  ;;  %2584 = vmatprep.mubr.bf16.mxu1 %v1134_v10 }
 0x5e8   :  { %v1097_v16 = vadd.f32 %v2559_v15, %v2176_v46  ;;  %v1088_v17 = vpop.f32.mrb[43].mxu0  ;;  %2585 = vmatmul.mubr.bf16.gmra.mrb[36].mxu1 %v1135_v9  ;;  %v1126_v23 = vmax.f32 %v1094_v12, 0.0 }
 0x5e9   :  { %v1089_v20 = vadd.f32 %v2176_v46, %v1088_v17  ;;  %v1124_v28 = vmax.f32 %v1086_v14, 0.0  ;;  %2633 = vmatpush3.bf16.msra.mxu1 %v2816_v49 }
 0x5ea   :  { %v1127_v27 = vmax.f32 %v1097_v16, 0.0  ;;  %2634 = vmatprep.subr.bf16.mxu1 %v2817_v50 }
 0x5eb   :  { %v1125_v29 = vmax.f32 %v1089_v20, 0.0 }
 0x5ec   :  { %v1137_v30 = vpack.c.bf16 %v1127_v27, %v1126_v23 }
 0x5ed   :  { %v1136_v31 = vpack.c.bf16 %v1125_v29, %v1124_v28  ;;  %v2562_v32 = vpop.f32.mrb[44].mxu0  ;;  %2635 = vmatpush3.bf16.msra.mxu1 %v2817_v50 }
 0x5ee   :  { %v1110_v33 = vadd.f32 %v2562_v32, %v2176_v46  ;;  %v1101_v34 = vpop.f32.mrb[45].mxu0 }
 0x5ef   :  { %v1102_v35 = vadd.f32 %v2176_v46, %v1101_v34  ;;  %v2563_v36 = vpop.f32.mrb[46].mxu0  ;;  %2588 = vmatprep.mubr.bf16.mxu1 %v1136_v31 }
 0x5f0   :  { %v1113_v37 = vadd.f32 %v2563_v36, %v2176_v46  ;;  %v1104_v38 = vpop.f32.mrb[47].mxu0  ;;  %2589 = vmatmul.mubr.bf16.gmra.mrb[40].mxu1 %v1137_v30  ;;  %v1130_v40 = vmax.f32 %v1110_v33, 0.0 }
 0x5f1   :  { %v1105_v39 = vadd.f32 %v2176_v46, %v1104_v38  ;;  %v1128_v42 = vmax.f32 %v1102_v35, 0.0  ;;  %v2818_v46 = vld [vmem:[#allocation19 + $0x20] sm:$0xff]  }
 0x5f2   :  { %v1131_v41 = vmax.f32 %v1113_v37, 0.0  ;;  %2636 = vmatprep.subr.bf16.mxu1 %v2818_v46 }
 0x5f3   :  { %v1129_v43 = vmax.f32 %v1105_v39, 0.0  ;;  %2637 = vmatpush3.bf16.msra.mxu1 %v2818_v46 }
 0x5f4   :  { %v1139_v44 = vpack.c.bf16 %v1131_v41, %v1130_v40  ;;  %2638 = vmatprep.subr.bf16.mxu1 %v2819_v51 }
 0x5f5   :  { %v1138_v45 = vpack.c.bf16 %v1129_v43, %v1128_v42 }
 0x5f7   :  { %2592 = vmatprep.mubr.bf16.mxu1 %v1138_v45  ;;  %2639 = vmatpush3.bf16.msra.mxu1 %v2819_v51 }
 0x5f8   :  { %2593 = vmatmul.mubr.bf16.gmra.mrb[44].mxu1 %v1139_v44  ;;  %2640 = vmatprep.subr.bf16.mxu1 %v2820_v52 }
 0x5fb   :  { %2641 = vmatpush3.bf16.msra.mxu1 %v2820_v52 }
 0x6b3   :  { %v2582_v54 = vpop.f32.mrb[32].mxu1 }
 0x6b4   :  { %v1254_v55 = vadd.f32 %v2582_v54, %v2185_v53  ;;  %v1245_v56 = vpop.f32.mrb[33].mxu1  ;;  %v2822_v54 = vld [vmem:[#allocation22] sm:$0xff]  }
 0x6b5   :  { %v1246_v57 = vadd.f32 %v2185_v53, %v1245_v56  ;;  %v2583_v58 = vpop.f32.mrb[34].mxu1 }
 0x6b6   :  { %v1257_v5 = vadd.f32 %v2583_v58, %v2185_v53  ;;  %v1248_v59 = vpop.f32.mrb[35].mxu1  ;;  %v1310_v62 = vmax.f32 %v1254_v55, 0.0  ;;  %v2823_v55 = vld [vmem:[#allocation22 + $0x8] sm:$0xff]  }
 0x6b7   :  { %v1249_v61 = vadd.f32 %v2185_v53, %v1248_v59  ;;  %v1308_v0 = vmax.f32 %v1246_v57, 0.0 }
 0x6b8   :  { %v1311_v63 = vmax.f32 %v1257_v5, 0.0 }
 0x6b9   :  { %v1309_v1 = vmax.f32 %v1249_v61, 0.0 }
 0x6ba   :  { %v1325_v60 = vpack.c.bf16 %v1311_v63, %v1310_v62 }
 0x6bb   :  { %v1324_v2 = vpack.c.bf16 %v1309_v1, %v1308_v0  ;;  %v2586_v3 = vpop.f32.mrb[36].mxu1 }
 0x6bc   :  { %v1270_v6 = vadd.f32 %v2586_v3, %v2185_v53  ;;  %v1261_v4 = vpop.f32.mrb[37].mxu1 }
 0x6bd   :  { %v1262_v7 = vadd.f32 %v2185_v53, %v1261_v4  ;;  %v2587_v8 = vpop.f32.mrb[38].mxu1  ;;  %2596 = vmatprep.subr.bf16.mxu0 %v1324_v2 }
 0x6be   :  { %v1273_v9 = vadd.f32 %v2587_v8, %v2185_v53  ;;  %v1264_v10 = vpop.f32.mrb[39].mxu1  ;;  %2597 = vmatpush3.bf16.msra.mxu0 %v1324_v2  ;;  %v1314_v12 = vmax.f32 %v1270_v6, 0.0 }
 0x6bf   :  { %v1265_v11 = vadd.f32 %v2185_v53, %v1264_v10  ;;  %2598 = vmatprep.subr.bf16.mxu0 %v1325_v60  ;;  %v1312_v14 = vmax.f32 %v1262_v7, 0.0 }
 0x6c0   :  { %v1315_v13 = vmax.f32 %v1273_v9, 0.0 }
 0x6c1   :  { %v1313_v15 = vmax.f32 %v1265_v11, 0.0 }
 0x6c2   :  { %v1327_v16 = vpack.c.bf16 %v1315_v13, %v1314_v12  ;;  %2599 = vmatpush3.bf16.msra.mxu0 %v1325_v60  ;;  %v2828_v13 = vld [vmem:[#allocation22 + $0x30] sm:$0xff]  }
 0x6c3   :  { %v1326_v17 = vpack.c.bf16 %v1313_v15, %v1312_v14  ;;  %v2590_v20 = vpop.f32.mrb[40].mxu1  ;;  %v2829_v14 = vld [vmem:[#allocation22 + $0x38] sm:$0xff]  }
 0x6c4   :  { %v1286_v23 = vadd.f32 %v2590_v20, %v2185_v53  ;;  %v1277_v27 = vpop.f32.mrb[41].mxu1  ;;  %v2194_v15 = vld [vmem:[#allocation20] ss:$0 sm:$0xff] }
 0x6c5   :  { %v1278_v28 = vadd.f32 %v2185_v53, %v1277_v27  ;;  %v2591_v29 = vpop.f32.mrb[42].mxu1  ;;  %2600 = vmatprep.subr.bf16.mxu0 %v1326_v17 }
 0x6c6   :  { %v1289_v30 = vadd.f32 %v2591_v29, %v2185_v53  ;;  %v1280_v31 = vpop.f32.mrb[43].mxu1  ;;  %2601 = vmatpush3.bf16.msra.mxu0 %v1326_v17  ;;  %v1318_v33 = vmax.f32 %v1286_v23, 0.0 }
 0x6c7   :  { %v1281_v32 = vadd.f32 %v2185_v53, %v1280_v31  ;;  %2602 = vmatprep.subr.bf16.mxu0 %v1327_v16  ;;  %v1316_v35 = vmax.f32 %v1278_v28, 0.0 }
 0x6c8   :  { %v1319_v34 = vmax.f32 %v1289_v30, 0.0 }
 0x6c9   :  { %v1317_v36 = vmax.f32 %v1281_v32, 0.0 }
 0x6ca   :  { %v1329_v37 = vpack.c.bf16 %v1319_v34, %v1318_v33  ;;  %2603 = vmatpush3.bf16.msra.mxu0 %v1327_v16 }
 0x6cb   :  { %v1328_v38 = vpack.c.bf16 %v1317_v36, %v1316_v35  ;;  %v2594_v39 = vpop.f32.mrb[44].mxu1 }
 0x6cc   :  { %v1302_v40 = vadd.f32 %v2594_v39, %v2185_v53  ;;  %v1293_v41 = vpop.f32.mrb[45].mxu1 }
 0x6cd   :  { %v1294_v42 = vadd.f32 %v2185_v53, %v1293_v41  ;;  %v2595_v43 = vpop.f32.mrb[46].mxu1  ;;  %2604 = vmatprep.subr.bf16.mxu0 %v1328_v38 }
 0x6ce   :  { %v1305_v44 = vadd.f32 %v2595_v43, %v2185_v53  ;;  %v1296_v45 = vpop.f32.mrb[47].mxu1  ;;  %2605 = vmatpush3.bf16.msra.mxu0 %v1328_v38  ;;  %v1322_v48 = vmax.f32 %v1302_v40, 0.0 }
 0x6cf   :  { %v1297_v47 = vadd.f32 %v2185_v53, %v1296_v45  ;;  %2606 = vmatprep.subr.bf16.mxu0 %v1329_v37  ;;  %v1320_v50 = vmax.f32 %v1294_v42, 0.0  ;;  %v2821_v53 = vld [vmem:[#allocation19 + $0x38] sm:$0xff]  }
 0x6d0   :  { %v1323_v49 = vmax.f32 %v1305_v44, 0.0  ;;  %2642 = vmatprep.subr.bf16.mxu1 %v2821_v53 }
 0x6d1   :  { %v1321_v46 = vmax.f32 %v1297_v47, 0.0  ;;  %2643 = vmatpush3.bf16.msra.mxu1 %v2821_v53 }
 0x6d2   :  { %v1331_v51 = vpack.c.bf16 %v1323_v49, %v1322_v48  ;;  %2607 = vmatpush3.bf16.msra.mxu0 %v1329_v37 }
 0x6d3   :  { %v1330_v52 = vpack.c.bf16 %v1321_v46, %v1320_v50 }
 0x6d5   :  { %2608 = vmatprep.subr.bf16.mxu0 %v1330_v52 }
 0x6d6   :  { %2609 = vmatpush3.bf16.msra.mxu0 %v1330_v52 }
 0x6d7   :  { %2610 = vmatprep.subr.bf16.mxu0 %v1331_v51 }
 0x6da   :  { %2611 = vmatpush3.bf16.msra.mxu0 %v1331_v51 }
 0x6db   :  { %2660 = vmatprep.subr.bf16.mxu0 %v2822_v54 }
 0x6dd   :  { %2613 = vmatmul.mubr.bf16.vlgmr.msra.gmra.mrb[48].mxu0 %v3618_v18  ;;  %v2824_v18 = vld [vmem:[#allocation22 + $0x10] sm:$0xff]  }
 0x6de   :  { %2616 = vmatprep.mubr.bf16.mxu0 %v3620_v19  ;;  %2661 = vmatpush3.bf16.msra.mxu0 %v2822_v54  ;;  %v2825_v19 = vld [vmem:[#allocation22 + $0x18] sm:$0xff]  }
 0x6df   :  { %2662 = vmatprep.subr.bf16.mxu0 %v2823_v55 }
 0x6e2   :  { %2663 = vmatpush3.bf16.msra.mxu0 %v2823_v55 }
 0x6e3   :  { %2664 = vmatprep.subr.bf16.mxu0 %v2824_v18 }
 0x6e5   :  { %2617 = vmatmul.mubr.bf16.gmra.mrb[52].mxu0 %v3624_v21  ;;  %v2826_v21 = vld [vmem:[#allocation22 + $0x20] sm:$0xff]  }
 0x6e6   :  { %2620 = vmatprep.mubr.bf16.mxu0 %v3626_v22  ;;  %2665 = vmatpush3.bf16.msra.mxu0 %v2824_v18  ;;  %v2827_v22 = vld [vmem:[#allocation22 + $0x28] sm:$0xff]  }
 0x6e7   :  { %2666 = vmatprep.subr.bf16.mxu0 %v2825_v19 }
 0x6ea   :  { %2667 = vmatpush3.bf16.msra.mxu0 %v2825_v19 }
 0x6eb   :  { %2668 = vmatprep.subr.bf16.mxu0 %v2826_v21 }
 0x6ed   :  { %2621 = vmatmul.mubr.bf16.gmra.mrb[56].mxu0 %v3630_v24 }
 0x6ee   :  { %2624 = vmatprep.mubr.bf16.mxu0 %v3632_v25  ;;  %2669 = vmatpush3.bf16.msra.mxu0 %v2826_v21 }
 0x6ef   :  { %2670 = vmatprep.subr.bf16.mxu0 %v2827_v22 }
 0x6f2   :  { %2671 = vmatpush3.bf16.msra.mxu0 %v2827_v22 }
 0x6f3   :  { %2672 = vmatprep.subr.bf16.mxu0 %v2828_v13 }
 0x6f5   :  { %2625 = vmatmul.mubr.bf16.gmra.mrb[60].mxu0 %v3636_v26 }
 0x6f6   :  { %2673 = vmatpush3.bf16.msra.mxu0 %v2828_v13  ;;  %v2833_v13 = vld [vmem:[#allocation26 + $0x18] sm:$0xff]  }
 0x6f7   :  { %2674 = vmatprep.subr.bf16.mxu0 %v2829_v14 }
 0x6fa   :  { %2675 = vmatpush3.bf16.msra.mxu0 %v2829_v14  ;;  %v2834_v14 = vld [vmem:[#allocation26 + $0x20] sm:$0xff]  }
 0x7b0   :  { %v2614_v24 = vpop.f32.mrb[48].mxu0 }
 0x7b1   :  { %v1366_v25 = vpop.f32.mrb[49].mxu0 }
 0x7b2   :  { %v2615_v26 = vpop.f32.mrb[50].mxu0 }
 0x7b3   :  { %v1430_v56 = vpack.c.bf16 %v2615_v26, %v2614_v24  ;;  %v1369_v57 = vpop.f32.mrb[51].mxu0 }
 0x7b4   :  { %v1429_v58 = vpack.c.bf16 %v1369_v57, %v1366_v25 }
 0x7b6   :  { %2644 = vmatprep.mubr.bf16.mxu1 %v1429_v58 }
 0x7b7   :  { %2645 = vmatmul.mubr.bf16.vlgmr.msra.gmra.mrb[48].mxu1 %v1430_v56 }
 0x7b8   :  { %v2618_v5 = vpop.f32.mrb[52].mxu0 }
 0x7b9   :  { %v1382_v59 = vpop.f32.mrb[53].mxu0 }
 0x7ba   :  { %v2619_v61 = vpop.f32.mrb[54].mxu0 }
 0x7bb   :  { %v1432_v62 = vpack.c.bf16 %v2619_v61, %v2618_v5  ;;  %v1385_v63 = vpop.f32.mrb[55].mxu0 }
 0x7bc   :  { %v1431_v0 = vpack.c.bf16 %v1385_v63, %v1382_v59 }
 0x7be   :  { %2648 = vmatprep.mubr.bf16.mxu1 %v1431_v0 }
 0x7bf   :  { %2649 = vmatmul.mubr.bf16.gmra.mrb[52].mxu1 %v1432_v62 }
 0x7c0   :  { %v2622_v1 = vpop.f32.mrb[56].mxu0 }
 0x7c1   :  { %v1398_v60 = vpop.f32.mrb[57].mxu0 }
 0x7c2   :  { %v2623_v2 = vpop.f32.mrb[58].mxu0 }
 0x7c3   :  { %v1434_v3 = vpack.c.bf16 %v2623_v2, %v2622_v1  ;;  %v1401_v6 = vpop.f32.mrb[59].mxu0 }
 0x7c4   :  { %v1433_v4 = vpack.c.bf16 %v1401_v6, %v1398_v60 }
 0x7c6   :  { %2652 = vmatprep.mubr.bf16.mxu1 %v1433_v4 }
 0x7c7   :  { %2653 = vmatmul.mubr.bf16.gmra.mrb[56].mxu1 %v1434_v3 }
 0x7c8   :  { %v2626_v7 = vpop.f32.mrb[60].mxu0 }
 0x7c9   :  { %v1414_v8 = vpop.f32.mrb[61].mxu0 }
 0x7ca   :  { %v2627_v9 = vpop.f32.mrb[62].mxu0 }
 0x7cb   :  { %v1436_v10 = vpack.c.bf16 %v2627_v9, %v2626_v7  ;;  %v1417_v11 = vpop.f32.mrb[63].mxu0 }
 0x7cc   :  { %v1435_v12 = vpack.c.bf16 %v1417_v11, %v1414_v8  ;;  %v3655_v8 = vld [vmem:[#allocation25] sm:$0xff]  ;;  %v2831_v11 = vld [vmem:[#allocation26 + $0x8] sm:$0xff]  }
 0x7cd   :  { %v1822_v9 = vunpack.c.l.s8.bf16 %v3655_v8 }
 0x7ce   :  { %2656 = vmatprep.mubr.bf16.mxu1 %v1435_v12  ;;  %v2832_v12 = vld [vmem:[#allocation26 + $0x10] sm:$0xff]  }
 0x7cf   :  { %2657 = vmatmul.mubr.bf16.gmra.mrb[60].mxu1 %v1436_v10  ;;  %v2830_v10 = vld [vmem:[#allocation26] sm:$0xff]  }
 0x7d0   :  { %2708 = vmatprep.mubr.bf16.mxu1 %v1822_v9  ;;  %2712 = vmatprep.subr.bf16.mxu0 %v2830_v10 }
 0x88a   :  { %v2646_v16 = vpop.f32.mrb[48].mxu1 }
 0x88b   :  { %v1551_v17 = vadd.f32 %v2646_v16, %v2194_v15  ;;  %v1542_v20 = vpop.f32.mrb[49].mxu1  ;;  %v2836_v16 = vld [vmem:[#allocation26 + $0x30] sm:$0xff]  }
 0x88c   :  { %v1543_v23 = vadd.f32 %v2194_v15, %v1542_v20  ;;  %v2647_v27 = vpop.f32.mrb[50].mxu1 }
 0x88d   :  { %v1554_v28 = vadd.f32 %v2647_v27, %v2194_v15  ;;  %v1545_v29 = vpop.f32.mrb[51].mxu1  ;;  %v1607_v31 = vmax.f32 %v1551_v17, 0.0  ;;  %v2203_v17 = vld [vmem:[#allocation23] ss:$0 sm:$0xff] }
 0x88e   :  { %v1546_v30 = vadd.f32 %v2194_v15, %v1545_v29  ;;  %v1605_v33 = vmax.f32 %v1543_v23, 0.0 }
 0x88f   :  { %v1608_v32 = vmax.f32 %v1554_v28, 0.0 }
 0x890   :  { %v1606_v34 = vmax.f32 %v1546_v30, 0.0 }
 0x891   :  { %v1622_v35 = vpack.c.bf16 %v1608_v32, %v1607_v31 }
 0x892   :  { %v1621_v36 = vpack.c.bf16 %v1606_v34, %v1605_v33  ;;  %v2650_v37 = vpop.f32.mrb[52].mxu1 }
 0x893   :  { %v1567_v38 = vadd.f32 %v2650_v37, %v2194_v15  ;;  %v1558_v39 = vpop.f32.mrb[53].mxu1 }
 0x894   :  { %v1559_v40 = vadd.f32 %v2194_v15, %v1558_v39  ;;  %v2651_v41 = vpop.f32.mrb[54].mxu1  ;;  %2676 = vmatprep.mubr.bf16.mxu0 %v1621_v36 }
 0x895   :  { %v1570_v42 = vadd.f32 %v2651_v41, %v2194_v15  ;;  %v1561_v43 = vpop.f32.mrb[55].mxu1  ;;  %2677 = vmatmul.mubr.bf16.vlgmr.msra.gmra.mrb[64].mxu0 %v1622_v35  ;;  %v1611_v45 = vmax.f32 %v1567_v38, 0.0 }
 0x896   :  { %v1562_v44 = vadd.f32 %v2194_v15, %v1561_v43  ;;  %v1609_v48 = vmax.f32 %v1559_v40, 0.0  ;;  %2713 = vmatpush3.bf16.msra.mxu0 %v2830_v10 }
 0x897   :  { %v1612_v47 = vmax.f32 %v1570_v42, 0.0  ;;  %2714 = vmatprep.subr.bf16.mxu0 %v2831_v11 }
 0x898   :  { %v1610_v49 = vmax.f32 %v1562_v44, 0.0 }
 0x899   :  { %v1624_v50 = vpack.c.bf16 %v1612_v47, %v1611_v45 }
 0x89a   :  { %v1623_v46 = vpack.c.bf16 %v1610_v49, %v1609_v48  ;;  %v2654_v51 = vpop.f32.mrb[56].mxu1  ;;  %2715 = vmatpush3.bf16.msra.mxu0 %v2831_v11  ;;  %v1823_v11 = vunpack.c.h.s8.bf16 %v3655_v8  ;;  %v2840_v8 = vld [vmem:[%s3738_s10 + $0x10] sm:$0xff]  }
 0x89b   :  { %v1583_v52 = vadd.f32 %v2654_v51, %v2194_v15  ;;  %v1574_v53 = vpop.f32.mrb[57].mxu1  ;;  %2716 = vmatprep.subr.bf16.mxu0 %v2832_v12 }
 0x89c   :  { %v1575_v54 = vadd.f32 %v2194_v15, %v1574_v53  ;;  %v2655_v55 = vpop.f32.mrb[58].mxu1  ;;  %2680 = vmatprep.mubr.bf16.mxu0 %v1623_v46 }
 0x89d   :  { %v1586_v18 = vadd.f32 %v2655_v55, %v2194_v15  ;;  %v1577_v19 = vpop.f32.mrb[59].mxu1  ;;  %2681 = vmatmul.mubr.bf16.gmra.mrb[68].mxu0 %v1624_v50  ;;  %v1615_v22 = vmax.f32 %v1583_v52, 0.0 }
 0x89e   :  { %v1578_v21 = vadd.f32 %v2194_v15, %v1577_v19  ;;  %v1613_v25 = vmax.f32 %v1575_v54, 0.0  ;;  %2717 = vmatpush3.bf16.msra.mxu0 %v2832_v12  ;;  %v2837_v12 = vld [vmem:[#allocation26 + $0x38] sm:$0xff]  }
 0x89f   :  { %v1616_v24 = vmax.f32 %v1586_v18, 0.0  ;;  %2718 = vmatprep.subr.bf16.mxu0 %v2833_v13 }
 0x8a0   :  { %v1614_v26 = vmax.f32 %v1578_v21, 0.0 }
 0x8a1   :  { %v1626_v56 = vpack.c.bf16 %v1616_v24, %v1615_v22 }
 0x8a2   :  { %v1625_v57 = vpack.c.bf16 %v1614_v26, %v1613_v25  ;;  %v2658_v58 = vpop.f32.mrb[60].mxu1  ;;  %2719 = vmatpush3.bf16.msra.mxu0 %v2833_v13  ;;  %v2838_v13 = vld [vmem:[%s3738_s10] sm:$0xff]  }
 0x8a3   :  { %v1599_v5 = vadd.f32 %v2658_v58, %v2194_v15  ;;  %v1590_v59 = vpop.f32.mrb[61].mxu1  ;;  %2720 = vmatprep.subr.bf16.mxu0 %v2834_v14 }
 0x8a4   :  { %v1591_v61 = vadd.f32 %v2194_v15, %v1590_v59  ;;  %v2659_v62 = vpop.f32.mrb[62].mxu1  ;;  %2684 = vmatprep.mubr.bf16.mxu0 %v1625_v57 }
 0x8a5   :  { %v1602_v63 = vadd.f32 %v2659_v62, %v2194_v15  ;;  %v1593_v0 = vpop.f32.mrb[63].mxu1  ;;  %2685 = vmatmul.mubr.bf16.gmra.mrb[72].mxu0 %v1626_v56  ;;  %v1619_v60 = vmax.f32 %v1599_v5, 0.0 }
 0x8a6   :  { %v1594_v1 = vadd.f32 %v2194_v15, %v1593_v0  ;;  %v1617_v3 = vmax.f32 %v1591_v61, 0.0  ;;  %v2835_v15 = vld [vmem:[#allocation26 + $0x28] sm:$0xff]   ;;  %2721 = vmatpush3.bf16.msra.mxu0 %v2834_v14  ;;  %v2839_v14 = vld [vmem:[%s3738_s10 + $0x8] sm:$0xff]  }
 0x8a7   :  { %v1620_v2 = vmax.f32 %v1602_v63, 0.0  ;;  %2722 = vmatprep.subr.bf16.mxu0 %v2835_v15 }
 0x8a8   :  { %v1618_v6 = vmax.f32 %v1594_v1, 0.0 }
 0x8a9   :  { %v1628_v4 = vpack.c.bf16 %v1620_v2, %v1619_v60 }
 0x8aa   :  { %v1627_v7 = vpack.c.bf16 %v1618_v6, %v1617_v3  ;;  %2723 = vmatpush3.bf16.msra.mxu0 %v2835_v15  ;;  %v2841_v15 = vld [vmem:[%s3738_s10 + $0x18] sm:$0xff]  }
 0x8ab   :  { %2724 = vmatprep.subr.bf16.mxu0 %v2836_v16 }
 0x8ac   :  { %2688 = vmatprep.mubr.bf16.mxu0 %v1627_v7 }
 0x8ad   :  { %2689 = vmatmul.mubr.bf16.gmra.mrb[76].mxu0 %v1628_v4 }
 0x8ae   :  { %2725 = vmatpush3.bf16.msra.mxu0 %v2836_v16  ;;  %v2842_v16 = vld [vmem:[%s3738_s10 + $0x20] sm:$0xff]  }
 0x8af   :  { %2726 = vmatprep.subr.bf16.mxu0 %v2837_v12 }
 0x8b2   :  { %2727 = vmatpush3.bf16.msra.mxu0 %v2837_v12 }
 0x968   :  { %v2678_v20 = vpop.f32.mrb[64].mxu0 }
 0x969   :  { %v1743_v23 = vadd.f32 %v2678_v20, %v2203_v17  ;;  %v1734_v27 = vpop.f32.mrb[65].mxu0 }
 0x96a   :  { %v1735_v28 = vadd.f32 %v2203_v17, %v1734_v27  ;;  %v2679_v29 = vpop.f32.mrb[66].mxu0 }
 0x96b   :  { %v1746_v30 = vadd.f32 %v2679_v29, %v2203_v17  ;;  %v1737_v31 = vpop.f32.mrb[67].mxu0  ;;  %v1799_v33 = vmax.f32 %v1743_v23, 0.0 }
 0x96c   :  { %v1738_v32 = vadd.f32 %v2203_v17, %v1737_v31  ;;  %v1797_v35 = vmax.f32 %v1735_v28, 0.0  ;;  %v2844_v31 = vld [vmem:[%s3738_s10 + $0x30] sm:$0xff]  }
 0x96d   :  { %v1800_v34 = vmax.f32 %v1746_v30, 0.0 }
 0x96e   :  { %v1798_v36 = vmax.f32 %v1738_v32, 0.0  ;;  %v2845_v32 = vld [vmem:[%s3738_s10 + $0x38] sm:$0xff]  }
 0x96f   :  { %v1814_v37 = vpack.c.bf16 %v1800_v34, %v1799_v33  ;;  %v2212_v33 = vld [vmem:[#allocation28] ss:$0 sm:$0xff] }
 0x970   :  { %v1813_v38 = vpack.c.bf16 %v1798_v36, %v1797_v35  ;;  %v2682_v39 = vpop.f32.mrb[68].mxu0 }
 0x971   :  { %v1759_v40 = vadd.f32 %v2682_v39, %v2203_v17  ;;  %v1750_v41 = vpop.f32.mrb[69].mxu0 }
 0x972   :  { %v1751_v42 = vadd.f32 %v2203_v17, %v1750_v41  ;;  %v2683_v43 = vpop.f32.mrb[70].mxu0  ;;  %2692 = vmatprep.subr.bf16.mxu1 %v1813_v38 }
 0x973   :  { %v1762_v44 = vadd.f32 %v2683_v43, %v2203_v17  ;;  %v1753_v45 = vpop.f32.mrb[71].mxu0  ;;  %2693 = vmatpush3.bf16.msra.mxu1 %v1813_v38  ;;  %v1803_v48 = vmax.f32 %v1759_v40, 0.0 }
 0x974   :  { %v1754_v47 = vadd.f32 %v2203_v17, %v1753_v45  ;;  %2694 = vmatprep.subr.bf16.mxu1 %v1814_v37  ;;  %v1801_v50 = vmax.f32 %v1751_v42, 0.0 }
 0x975   :  { %v1804_v49 = vmax.f32 %v1762_v44, 0.0 }
 0x976   :  { %v1802_v46 = vmax.f32 %v1754_v47, 0.0 }
 0x977   :  { %v1816_v51 = vpack.c.bf16 %v1804_v49, %v1803_v48  ;;  %2695 = vmatpush3.bf16.msra.mxu1 %v1814_v37  ;;  %v2221_v49 = vld [vmem:[%s3739_s5] ss:$0 sm:$0xff] }
 0x978   :  { %v1815_v52 = vpack.c.bf16 %v1802_v46, %v1801_v50  ;;  %v2686_v53 = vpop.f32.mrb[72].mxu0 }
 0x979   :  { %v1775_v54 = vadd.f32 %v2686_v53, %v2203_v17  ;;  %v1766_v55 = vpop.f32.mrb[73].mxu0 }
 0x97a   :  { %v1767_v18 = vadd.f32 %v2203_v17, %v1766_v55  ;;  %v2687_v19 = vpop.f32.mrb[74].mxu0  ;;  %2696 = vmatprep.subr.bf16.mxu1 %v1815_v52 }
 0x97b   :  { %v1778_v21 = vadd.f32 %v2687_v19, %v2203_v17  ;;  %v1769_v22 = vpop.f32.mrb[75].mxu0  ;;  %2697 = vmatpush3.bf16.msra.mxu1 %v1815_v52  ;;  %v1807_v25 = vmax.f32 %v1775_v54, 0.0 }
 0x97c   :  { %v1770_v24 = vadd.f32 %v2203_v17, %v1769_v22  ;;  %2698 = vmatprep.subr.bf16.mxu1 %v1816_v51  ;;  %v1805_v56 = vmax.f32 %v1767_v18, 0.0 }
 0x97d   :  { %v1808_v26 = vmax.f32 %v1778_v21, 0.0 }
 0x97e   :  { %v1806_v57 = vmax.f32 %v1770_v24, 0.0 }
 0x97f   :  { %v1818_v58 = vpack.c.bf16 %v1808_v26, %v1807_v25  ;;  %2699 = vmatpush3.bf16.msra.mxu1 %v1816_v51 }
 0x980   :  { %v1817_v5 = vpack.c.bf16 %v1806_v57, %v1805_v56  ;;  %v2690_v59 = vpop.f32.mrb[76].mxu0 }
 0x981   :  { %v1791_v61 = vadd.f32 %v2690_v59, %v2203_v17  ;;  %v1782_v62 = vpop.f32.mrb[77].mxu0 }
 0x982   :  { %v1783_v63 = vadd.f32 %v2203_v17, %v1782_v62  ;;  %v2691_v0 = vpop.f32.mrb[78].mxu0  ;;  %2700 = vmatprep.subr.bf16.mxu1 %v1817_v5 }
 0x983   :  { %v1794_v1 = vadd.f32 %v2691_v0, %v2203_v17  ;;  %v1785_v60 = vpop.f32.mrb[79].mxu0  ;;  %2701 = vmatpush3.bf16.msra.mxu1 %v1817_v5  ;;  %v1811_v3 = vmax.f32 %v1791_v61, 0.0 }
 0x984   :  { %v1786_v2 = vadd.f32 %v2203_v17, %v1785_v60  ;;  %2702 = vmatprep.subr.bf16.mxu1 %v1818_v58  ;;  %v1809_v4 = vmax.f32 %v1783_v63, 0.0  ;;  %v2843_v17 = vld [vmem:[%s3738_s10 + $0x28] sm:$0xff]  }
 0x985   :  { %v1812_v6 = vmax.f32 %v1794_v1, 0.0 }
 0x986   :  { %v1810_v7 = vmax.f32 %v1786_v2, 0.0 }
 0x987   :  { %v1820_v9 = vpack.c.bf16 %v1812_v6, %v1811_v3  ;;  %2703 = vmatpush3.bf16.msra.mxu1 %v1818_v58 }
 0x988   :  { %v1819_v10 = vpack.c.bf16 %v1810_v7, %v1809_v4 }
 0x98a   :  { %2704 = vmatprep.subr.bf16.mxu1 %v1819_v10 }
 0x98b   :  { %2705 = vmatpush3.bf16.msra.mxu1 %v1819_v10 }
 0x98c   :  { %2706 = vmatprep.subr.bf16.mxu1 %v1820_v9 }
 0x98f   :  { %2707 = vmatpush3.bf16.msra.mxu1 %v1820_v9 }
 0x990   :  { %2732 = vmatprep.subr.bf16.mxu1 %v2838_v13 }
 0x992   :  { %2709 = vmatmul.mubr.bf16.vlgmr.msra.gmra.mrb[64].mxu1 %v1823_v11 }
 0x993   :  { %2733 = vmatpush3.bf16.msra.mxu1 %v2838_v13 }
 0x994   :  { %2734 = vmatprep.subr.bf16.mxu1 %v2839_v14 }
 0x997   :  { %2735 = vmatpush3.bf16.msra.mxu1 %v2839_v14 }
 0x998   :  { %2736 = vmatprep.subr.bf16.mxu1 %v2840_v8 }
 0x99b   :  { %2737 = vmatpush3.bf16.msra.mxu1 %v2840_v8 }
 0x99c   :  { %2738 = vmatprep.subr.bf16.mxu1 %v2841_v15 }
 0x99f   :  { %2739 = vmatpush3.bf16.msra.mxu1 %v2841_v15 }
 0x9a0   :  { %2740 = vmatprep.subr.bf16.mxu1 %v2842_v16 }
 0x9a3   :  { %2741 = vmatpush3.bf16.msra.mxu1 %v2842_v16 }
 0x9a4   :  { %2742 = vmatprep.subr.bf16.mxu1 %v2843_v17 }
 0x9a7   :  { %2743 = vmatpush3.bf16.msra.mxu1 %v2843_v17 }
 0x9a8   :  { %2744 = vmatprep.subr.bf16.mxu1 %v2844_v31 }
 0x9ab   :  { %2745 = vmatpush3.bf16.msra.mxu1 %v2844_v31 }
 0x9ac   :  { %2746 = vmatprep.subr.bf16.mxu1 %v2845_v32 }
 0x9af   :  { %2747 = vmatpush3.bf16.msra.mxu1 %v2845_v32 }
 0xa65   :  { %v2710_v20 = vpop.f32.mrb[64].mxu1 }
 0xa66   :  { %v1858_v23 = vpop.f32.mrb[65].mxu1 }
 0xa67   :  { %v2711_v27 = vpop.f32.mrb[66].mxu1 }
 0xa68   :  { %v1874_v28 = vpack.c.bf16 %v2711_v27, %v2710_v20  ;;  %v1861_v29 = vpop.f32.mrb[67].mxu1 }
 0xa69   :  { %v1873_v30 = vpack.c.bf16 %v1861_v29, %v1858_v23 }
 0xa6b   :  { %2728 = vmatprep.mubr.bf16.mxu0 %v1873_v30 }
 0xa6c   :  { %2729 = vmatmul.mubr.bf16.vlgmr.msra.gmra.mrb[80].mxu0 %v1874_v28 }
 0xb3f   :  { %v2730_v34 = vpop.f32.mrb[80].mxu0 }
 0xb40   :  { %v1989_v35 = vadd.f32 %v2730_v34, %v2212_v33  ;;  %v1980_v36 = vpop.f32.mrb[81].mxu0 }
 0xb41   :  { %v1981_v37 = vadd.f32 %v2212_v33, %v1980_v36  ;;  %v2731_v38 = vpop.f32.mrb[82].mxu0 }
 0xb42   :  { %v1992_v39 = vadd.f32 %v2731_v38, %v2212_v33  ;;  %v1983_v40 = vpop.f32.mrb[83].mxu0  ;;  %v1997_v42 = vmax.f32 %v1989_v35, 0.0 }
 0xb43   :  { %v1984_v41 = vadd.f32 %v2212_v33, %v1983_v40  ;;  %v1995_v44 = vmax.f32 %v1981_v37, 0.0 }
 0xb44   :  { %v1998_v43 = vmax.f32 %v1992_v39, 0.0 }
 0xb45   :  { %v1996_v45 = vmax.f32 %v1984_v41, 0.0 }
 0xb46   :  { %v2000_v47 = vpack.c.bf16 %v1998_v43, %v1997_v42 }
 0xb47   :  { %v1999_v48 = vpack.c.bf16 %v1996_v45, %v1995_v44 }
 0xb49   :  { %2748 = vmatprep.mubr.bf16.mxu1 %v1999_v48 }
 0xb4a   :  { %2749 = vmatmul.mubr.bf16.vlgmr.msra.gmra.mrb[68].mxu1 %v2000_v47 }
 0xc1d   :  { %v2750_v50 = vpop.f32.mrb[68].mxu1 }
 0xc1e   :  { %v2115_v46 = vadd.f32 %v2750_v50, %v2221_v49  ;;  %v2106_v51 = vpop.f32.mrb[69].mxu1 }
 0xc1f   :  { %v2107_v52 = vadd.f32 %v2221_v49, %v2106_v51  ;;  %v2751_v53 = vpop.f32.mrb[70].mxu1 }
 0xc20   :  { %2123 = vst [vmem:[#allocation29 + $0x10] sm:$0xff] %v2115_v46  ;;  %v2118_v54 = vadd.f32 %v2751_v53, %v2221_v49  ;;  %v2109_v55 = vpop.f32.mrb[71].mxu1 }
 0xc21   :  { %2121 = vst [vmem:[#allocation29] sm:$0xff] %v2107_v52  ;;  %v2110_v18 = vadd.f32 %v2221_v49, %v2109_v55 }
 0xc22   :  { %2124 = vst [vmem:[#allocation29 + $0x18] sm:$0xff] %v2118_v54 }
 0xc23   :  { %2122 = vst [vmem:[#allocation29 + $0x8] sm:$0xff] %v2110_v18 }
 0xc24   :  { %3231 = shalt.err (!%p3228_p0)
}
 0xc25   :  { %s3740_s17 = sld [smem:[#allocation46_spill]] }
 0xc2b   :  { %s3232_s13 = scalar_lea.hbm %s3740_s17, 512 }
 0xc2c   :  { %p3233_p1 = scmp.ne.s32.totalorder %s3740_s17, %s3232_s13  ;;  %p3236_p2 = scmp.lt.u32.totalorder %s3232_s13, %s3740_s17 }
 0xc2e   :  { %p3238_p3 = pnand %p3236_p2, %p3233_p1 }
 0xc30   :  { %3241 = shalt.err (!%p3238_p3)
}
 0xc31   :  { %2136 = dma.vmem_to_hbm [thread:$0]  %s2131_s29, 512, %s3740_s17, [#allocation4], %s3273_s15, %s3273_s15, %s3274_s30  }
 0xc32   :  { %3260 = dma.done.wait [#allocation4], 512  }
 0xc33   :  { %3261 = vsyncadd [#allocation4], 4294966784 }
 0xc34   :  { %2140 = vsyncpa [#allocation3], 1 }
 0xc35   :  { %2141 = vsyncpa [#allocation6], 1 }
 0xc36   :  { %2142 = vsyncpa [#allocation9], 1 }
 0xc37   :  { %2143 = vsyncpa [#allocation12], 1 }
 0xc38   :  { %2144 = vsyncpa [#allocation15], 1 }
 0xc39   :  { %2145 = vsyncpa [#allocation18], 1 }
 0xc3a   :  { %2146 = vsyncpa [#allocation21], 1 }
 0xc3b   :  { %2147 = vsyncpa [#allocation24], 1 }
 0xc3c   :  { %2148 = vsyncpa [#allocation27], 1 }
 0xc3d   :  { %2149 = vsyncpa [#allocation4], 1 }

</bundles_post_ra>
